<compile_context>
chip_gen: v7x
topology: tpu7x:2x2x1
jax: 0.10.0
libtpu: 0.0.40
codegen_flags: <defaults>
</compile_context>

<pallas_src>
import jax
import jax.numpy as jnp
from jax.experimental import pallas as pl
from jax.experimental.pallas import tpu as pltpu

VOCAB = 8894
H = 128   # input_size == hidden_size == 128 (fixed by the module)


# ---------------------------------------------------------------------------
# Fused batched LSTM encoder + masked-mean readouts (one grid step per path)
# PyTorch gate order: i, f, g, o
# ---------------------------------------------------------------------------
def encode_kernel(x_ref, msk_ref, wih_ref, whh_ref, b_ref, out_ref, ori_ref):
    S, B, Hh = x_ref.shape                      # time-major block (S, B, H)
    x2 = x_ref[...].reshape(S * B, Hh)          # (S*B, H), VMEM resident
    m2 = msk_ref[...].reshape(S * B, 1)         # (S*B, 1)

    # Hoisted input projection: one MXU matmul for the whole sequence.
    xg = jnp.dot(x2, wih_ref[...],
                 preferred_element_type=jnp.float32) + b_ref[...]   # (S*B, 4H)

    h = jnp.zeros((B, Hh), jnp.float32)
    c = jnp.zeros((B, Hh), jnp.float32)
    acc_h = jnp.zeros((B, Hh), jnp.float32)
    acc_x = jnp.zeros((B, Hh), jnp.float32)
    den = jnp.zeros((B, 1), jnp.float32)

    # Recurrence: only h @ W_hh left per step.  S is small & static -> fully
    # unrolled with static slices (no scratch, no dynamic indexing).
    for t in range(S):
        lo = t * B
        g = xg[lo:lo + B] + jnp.dot(h, whh_ref[...],
                                    preferred_element_type=jnp.float32)  # (B, 4H)
        i = jax.nn.sigmoid(g[:, 0 * Hh:1 * Hh])
        f = jax.nn.sigmoid(g[:, 1 * Hh:2 * Hh])
        gg = jnp.tanh(g[:, 2 * Hh:3 * Hh])
        o = jax.nn.sigmoid(g[:, 3 * Hh:4 * Hh])
        c = f * c + i * gg
        h = o * jnp.tanh(c)
        m_t = m2[lo:lo + B]                     # (B, 1)
        acc_h = acc_h + h * m_t
        acc_x = acc_x + x2[lo:lo + B] * m_t
        den = den + m_t

    out_ref[...] = acc_h / den                  # masked mean of LSTM outputs
    ori_ref[...] = acc_x / den                  # masked mean of raw embeddings


def encode_paths(x, msk, wih_t, whh_t, bias):
    """x: (P, S, B, H) time-major embeddings, msk: (P, S, B, 1)."""
    P, S, B, Hh = x.shape
    G = 4 * Hh
    return pl.pallas_call(
        encode_kernel,
        out_shape=(jax.ShapeDtypeStruct((P, B, Hh), jnp.float32),
                   jax.ShapeDtypeStruct((P, B, Hh), jnp.float32)),
        grid_spec=pltpu.PrefetchScalarGridSpec(
            num_scalar_prefetch=0,
            grid=(P,),
            in_specs=[
                pl.BlockSpec((None, S, B, Hh), lambda p: (p, 0, 0, 0)),
                pl.BlockSpec((None, S, B, 1), lambda p: (p, 0, 0, 0)),
                pl.BlockSpec((Hh, G), lambda p: (0, 0)),
                pl.BlockSpec((Hh, G), lambda p: (0, 0)),
                pl.BlockSpec((1, G), lambda p: (0, 0)),
            ],
            out_specs=(
                pl.BlockSpec((None, B, Hh), lambda p: (p, 0, 0)),
                pl.BlockSpec((None, B, Hh), lambda p: (p, 0, 0)),
            ),
        ),
        compiler_params=pltpu.CompilerParams(
            dimension_semantics=("parallel",)),   # paths are independent
    )(x, msk, wih_t, whh_t, bias)


# ---------------------------------------------------------------------------
# Fused discriminators.  Bilinear score:
#   sc[b, j] = h_p[b, j, :] @ W @ h_c[b, :] + bias  = h_p . (h_c @ W^T) + bias
# Masking (NEmbed * Mask) commutes with the bilinear form (bias added after),
# so it is applied as a lane-dense (B, 3S) multiply on the scores.
# ---------------------------------------------------------------------------
def disc_kernel(hc_ref, nemb_ref, nmsk_ref, pfeat_ref,
                wn_ref, wp_ref, bn_ref, bp_ref, out1_ref, out2_ref):
    hc = hc_ref[...]                                                  # (B, H)
    # node discriminator: 3 candidate blocks stacked along axis 1 -> (B, 3S)
    u_n = jnp.dot(hc, wn_ref[...], preferred_element_type=jnp.float32)   # (B, H)
    raw1 = jnp.sum(nemb_ref[...] * u_n[:, None, :], axis=-1)             # (B, 3S)
    out1_ref[...] = raw1 * nmsk_ref[...] + bn_ref[...]
    # path discriminator: 3 pooled path features -> (B, 3)
    u_p = jnp.dot(hc, wp_ref[...], preferred_element_type=jnp.float32)   # (B, H)
    raw2 = jnp.sum(pfeat_ref[...] * u_p[:, None, :], axis=-1)            # (B, 3)
    out2_ref[...] = raw2 + bp_ref[...]


def disc_scores(hc, node_emb, node_msk, path_feats, wn_t, wp_t, bn, bp):
    B = hc.shape[0]
    S3 = node_emb.shape[1]
    return pl.pallas_call(
        disc_kernel,
        out_shape=(jax.ShapeDtypeStruct((B, S3), jnp.float32),
                   jax.ShapeDtypeStruct((B, 3), jnp.float32)),
    )(hc, node_emb, node_msk, path_feats, wn_t, wp_t, bn, bp)


# ---------------------------------------------------------------------------
# Parameters (deterministic, shapes from the PyTorch module __init__)
# ---------------------------------------------------------------------------
def init_params(key):
    ks = jax.random.split(key, 8)
    lim = 1.0 / jnp.sqrt(jnp.float32(H))

    def uni(k, shape):
        return jax.random.uniform(k, shape, jnp.float32, -lim, lim)

    wih = uni(ks[2], (4 * H, H))                      # PyTorch (4H, input)
    whh = uni(ks[3], (4 * H, H))                      # PyTorch (4H, hidden)
    b_ih = uni(ks[4], (4 * H,))
    b_hh = uni(ks[5], (4 * H,))

    # xavier_uniform for Bilinear(H, H, 1) weight (1, H, H); stored transposed
    # so the kernel can compute u = h_c @ W^T directly.
    xav = jnp.sqrt(6.0 / (H * H + H))
    wd_node = jax.random.uniform(ks[6], (H, H), jnp.float32, -xav, xav)
    wd_path = jax.random.uniform(ks[7], (H, H), jnp.float32, -xav, xav)

    return dict(
        emb_path=jax.random.normal(ks[0], (VOCAB, H), jnp.float32),
        emb_node=jax.random.normal(ks[1], (VOCAB, H), jnp.float32),
        wih_t=wih.T,                                   # (H, 4H)
        whh_t=whh.T,                                   # (H, 4H)
        lstm_b=(b_ih + b_hh).reshape(1, 4 * H),
        Wd_node_t=wd_node.T, bd_node=jnp.zeros((1, 1), jnp.float32),
        Wd_path_t=wd_path.T, bd_path=jnp.zeros((1, 1), jnp.float32),
    )


# ---------------------------------------------------------------------------
# PIM forward
# ---------------------------------------------------------------------------
def pim_forward(params, Path1, Path1Mask, Path2, Path2Mask, Path3, Path3Mask,
                Pos1, Pos1Mask, Neg1, Neg1Mask, Neg2, Neg2Mask):
    B, S = Path1.shape

    # --- batched path encode: 3 paths in one kernel, time-major ---
    paths = jnp.stack([Path1, Path2, Path3], axis=0)               # (3, B, S)
    paths_t = jnp.transpose(paths, (0, 2, 1))                      # (3, S, B) tiny int transpose
    x = jnp.take(params['emb_path'], paths_t, axis=0)              # (3, S, B, H)
    masks = jnp.stack([Path1Mask, Path2Mask, Path3Mask], axis=0)   # (3, B, S, 1)
    masks_t = jnp.transpose(masks, (0, 2, 1, 3))                   # (3, S, B, 1)

    out_read, ori_read = encode_paths(
        x, masks_t, params['wih_t'], params['whh_t'], params['lstm_b'])

    Path1Embed = out_read[0]                                       # (B, H)  == h_c
    path_feats = jnp.stack(
        [ori_read[0], out_read[1], out_read[2]], axis=1)           # (B, 3, H)

    # --- node embeddings: 3 candidate sets stacked along the score axis ---
    node_tok = jnp.concatenate([Pos1, Neg1, Neg2], axis=1)         # (B, 3S)
    node_emb = jnp.take(params['emb_node'], node_tok, axis=0)      # (B, 3S, H)
    node_msk = jnp.concatenate(
        [Pos1Mask[:, :, 0], Neg1Mask[:, :, 0], Neg2Mask[:, :, 0]], axis=1)  # (B, 3S)

    # TODO(synk): the reference Discriminator.forward has no return statement
    # (it computes `logits` then implicitly returns None); we return the
    # computed logits instead so the kernel output is observable.
    logits1, logits2 = disc_scores(
        Path1Embed, node_emb, node_msk, path_feats,
        params['Wd_node_t'], params['Wd_path_t'],
        params['bd_node'], params['bd_path'])
    return logits1, logits2


if __name__ == "__main__":
    B, S = 2, 8
    key = jax.random.PRNGKey(0)
    kp, kd = jax.random.split(key)
    params = init_params(kp)

    ks = jax.random.split(kd, 12)

    def tok(k):
        return jax.random.randint(k, (B, S), 0, VOCAB, jnp.int32)

    def mask(k):
        lens = jax.random.randint(k, (B,), 1, S + 1)
        m = (jnp.arange(S)[None, :] < lens[:, None]).astype(jnp.float32)
        return m[:, :, None]                                       # (B, S, 1)

    Path1, Path2, Path3 = tok(ks[0]), tok(ks[1]), tok(ks[2])
    Pos1, Neg1, Neg2 = tok(ks[3]), tok(ks[4]), tok(ks[5])
    Path1Mask, Path2Mask, Path3Mask = mask(ks[6]), mask(ks[7]), mask(ks[8])
    Pos1Mask, Neg1Mask, Neg2Mask = mask(ks[9]), mask(ks[10]), mask(ks[11])

    fwd = jax.jit(pim_forward)
    logits1, logits2 = fwd(
        params, Path1, Path1Mask, Path2, Path2Mask, Path3, Path3Mask,
        Pos1, Pos1Mask, Neg1, Neg1Mask, Neg2, Neg2Mask)

    jax.block_until_ready((logits1, logits2))
    assert logits1.shape == (B, 3 * S), logits1.shape
    assert logits2.shape == (B, 3), logits2.shape
    assert jnp.all(jnp.isfinite(logits1)) and jnp.all(jnp.isfinite(logits2))
    print("KERNEL_OK")
</pallas_src>

<mosaic_0001>
module attributes {stable_mosaic.version = 11 : i64} {
  func.func @encode_kernel(%arg0: i32, %arg1: memref<1x8x2x128xf32, #tpu.memory_space<vmem>>, %arg2: memref<1x8x2x1xf32, #tpu.memory_space<vmem>>, %arg3: memref<128x512xf32, #tpu.memory_space<vmem>>, %arg4: memref<128x512xf32, #tpu.memory_space<vmem>>, %arg5: memref<1x512xf32, #tpu.memory_space<vmem>>, %arg6: memref<1x2x128xf32, #tpu.memory_space<vmem>>, %arg7: memref<1x2x128xf32, #tpu.memory_space<vmem>>) attributes {dimension_semantics = [#tpu.dimension_semantics<parallel>], iteration_bounds = array<i64: 3>, scalar_prefetch = 0 : i64, scratch_operands = 0 : i64, tpu.core_type = #tpu.core_type<tc>, window_params = [{transform_indices = @transform_0, window_bounds = array<i64: 1, 8, 2, 128>}, {transform_indices = @transform_1, window_bounds = array<i64: 1, 8, 2, 1>}, {pipeline_mode = #tpu.pipeline_mode<synchronous>, transform_indices = @transform_2, window_bounds = array<i64: 128, 512>}, {pipeline_mode = #tpu.pipeline_mode<synchronous>, transform_indices = @transform_3, window_bounds = array<i64: 128, 512>}, {pipeline_mode = #tpu.pipeline_mode<synchronous>, transform_indices = @transform_4, window_bounds = array<i64: 1, 512>}, {transform_indices = @transform_5, window_bounds = array<i64: 1, 2, 128>}, {transform_indices = @transform_6, window_bounds = array<i64: 1, 2, 128>}]} {
    %c0 = arith.constant 0 : index
    %c0_0 = arith.constant 0 : index
    %c0_1 = arith.constant 0 : index
    %c0_2 = arith.constant 0 : index
    %0 = vector.load %arg1[%c0, %c0_0, %c0_1, %c0_2] : memref<1x8x2x128xf32, #tpu.memory_space<vmem>>, vector<1x8x2x128xf32>
    %1 = vector.shape_cast %0 : vector<1x8x2x128xf32> to vector<8x2x128xf32>
    %2 = vector.shape_cast %1 : vector<8x2x128xf32> to vector<16x128xf32>
    %c0_3 = arith.constant 0 : index
    %c0_4 = arith.constant 0 : index
    %c0_5 = arith.constant 0 : index
    %c0_6 = arith.constant 0 : index
    %3 = vector.load %arg2[%c0_3, %c0_4, %c0_5, %c0_6] : memref<1x8x2x1xf32, #tpu.memory_space<vmem>>, vector<1x8x2x1xf32>
    %4 = vector.shape_cast %3 : vector<1x8x2x1xf32> to vector<8x2x1xf32>
    %5 = vector.shape_cast %4 : vector<8x2x1xf32> to vector<16x1xf32>
    %c0_7 = arith.constant 0 : index
    %c0_8 = arith.constant 0 : index
    %6 = vector.load %arg3[%c0_7, %c0_8] : memref<128x512xf32, #tpu.memory_space<vmem>>, vector<128x512xf32>
    %cst = arith.constant dense<0.000000e+00> : vector<16x512xf32>
    %7 = tpu.matmul %2, %6, %cst {dimension_numbers = #tpu.dot_dimension_numbers<[1], [0], [0], [1], [0, 0, 1, 1], [], []>} : vector<16x128xf32>, vector<128x512xf32>, vector<16x512xf32> -> vector<16x512xf32>
    %c0_9 = arith.constant 0 : index
    %c0_10 = arith.constant 0 : index
    %8 = vector.load %arg5[%c0_9, %c0_10] : memref<1x512xf32, #tpu.memory_space<vmem>>, vector<1x512xf32>
    %9 = vector.broadcast %8 : vector<1x512xf32> to vector<16x512xf32>
    %10 = arith.addf %7, %9 : vector<16x512xf32>
    %cst_11 = arith.constant 0.000000e+00 : f32
    %11 = vector.broadcast %cst_11 : f32 to vector<2x128xf32>
    %cst_12 = arith.constant 0.000000e+00 : f32
    %12 = vector.broadcast %cst_12 : f32 to vector<2x128xf32>
    %cst_13 = arith.constant 0.000000e+00 : f32
    %13 = vector.broadcast %cst_13 : f32 to vector<2x128xf32>
    %cst_14 = arith.constant 0.000000e+00 : f32
    %14 = vector.broadcast %cst_14 : f32 to vector<2x128xf32>
    %cst_15 = arith.constant 0.000000e+00 : f32
    %15 = vector.broadcast %cst_15 : f32 to vector<2x1xf32>
    %16 = vector.extract_strided_slice %10 {offsets = [0, 0], sizes = [2, 512], strides = [1, 1]} : vector<16x512xf32> to vector<2x512xf32>
    %c0_16 = arith.constant 0 : index
    %c0_17 = arith.constant 0 : index
    %17 = vector.load %arg4[%c0_16, %c0_17] : memref<128x512xf32, #tpu.memory_space<vmem>>, vector<128x512xf32>
    %cst_18 = arith.constant dense<0.000000e+00> : vector<2x512xf32>
    %18 = tpu.matmul %11, %17, %cst_18 {dimension_numbers = #tpu.dot_dimension_numbers<[1], [0], [0], [1], [0, 0, 1, 1], [], []>} : vector<2x128xf32>, vector<128x512xf32>, vector<2x512xf32> -> vector<2x512xf32>
    %19 = arith.addf %16, %18 : vector<2x512xf32>
    %20 = vector.extract_strided_slice %19 {offsets = [0, 0], sizes = [2, 128], strides = [1, 1]} : vector<2x512xf32> to vector<2x128xf32>
    %21 = arith.negf %20 : vector<2x128xf32>
    %22 = math.exp %21 : vector<2x128xf32>
    %cst_19 = arith.constant 1.000000e+00 : f32
    %23 = vector.broadcast %cst_19 : f32 to vector<2x128xf32>
    %24 = arith.addf %23, %22 : vector<2x128xf32>
    %25 = arith.divf %23, %24 : vector<2x128xf32>
    %26 = vector.extract_strided_slice %19 {offsets = [0, 128], sizes = [2, 128], strides = [1, 1]} : vector<2x512xf32> to vector<2x128xf32>
    %27 = arith.negf %26 : vector<2x128xf32>
    %28 = math.exp %27 : vector<2x128xf32>
    %cst_20 = arith.constant 1.000000e+00 : f32
    %29 = vector.broadcast %cst_20 : f32 to vector<2x128xf32>
    %30 = arith.addf %29, %28 : vector<2x128xf32>
    %31 = arith.divf %29, %30 : vector<2x128xf32>
    %32 = vector.extract_strided_slice %19 {offsets = [0, 256], sizes = [2, 128], strides = [1, 1]} : vector<2x512xf32> to vector<2x128xf32>
    %33 = math.tanh %32 : vector<2x128xf32>
    %34 = vector.extract_strided_slice %19 {offsets = [0, 384], sizes = [2, 128], strides = [1, 1]} : vector<2x512xf32> to vector<2x128xf32>
    %35 = arith.negf %34 : vector<2x128xf32>
    %36 = math.exp %35 : vector<2x128xf32>
    %cst_21 = arith.constant 1.000000e+00 : f32
    %37 = vector.broadcast %cst_21 : f32 to vector<2x128xf32>
    %38 = arith.addf %37, %36 : vector<2x128xf32>
    %39 = arith.divf %37, %38 : vector<2x128xf32>
    %40 = arith.mulf %31, %12 : vector<2x128xf32>
    %41 = arith.mulf %25, %33 : vector<2x128xf32>
    %42 = arith.addf %40, %41 : vector<2x128xf32>
    %43 = math.tanh %42 : vector<2x128xf32>
    %44 = arith.mulf %39, %43 : vector<2x128xf32>
    %45 = vector.extract_strided_slice %5 {offsets = [0, 0], sizes = [2, 1], strides = [1, 1]} : vector<16x1xf32> to vector<2x1xf32>
    %46 = vector.broadcast %45 : vector<2x1xf32> to vector<2x128xf32>
    %47 = arith.mulf %44, %46 : vector<2x128xf32>
    %48 = arith.addf %13, %47 : vector<2x128xf32>
    %49 = vector.extract_strided_slice %2 {offsets = [0, 0], sizes = [2, 128], strides = [1, 1]} : vector<16x128xf32> to vector<2x128xf32>
    %50 = vector.broadcast %45 : vector<2x1xf32> to vector<2x128xf32>
    %51 = arith.mulf %49, %50 : vector<2x128xf32>
    %52 = arith.addf %14, %51 : vector<2x128xf32>
    %53 = arith.addf %15, %45 : vector<2x1xf32>
    %54 = vector.extract_strided_slice %10 {offsets = [2, 0], sizes = [2, 512], strides = [1, 1]} : vector<16x512xf32> to vector<2x512xf32>
    %c0_22 = arith.constant 0 : index
    %c0_23 = arith.constant 0 : index
    %55 = vector.load %arg4[%c0_22, %c0_23] : memref<128x512xf32, #tpu.memory_space<vmem>>, vector<128x512xf32>
    %cst_24 = arith.constant dense<0.000000e+00> : vector<2x512xf32>
    %56 = tpu.matmul %44, %55, %cst_24 {dimension_numbers = #tpu.dot_dimension_numbers<[1], [0], [0], [1], [0, 0, 1, 1], [], []>} : vector<2x128xf32>, vector<128x512xf32>, vector<2x512xf32> -> vector<2x512xf32>
    %57 = arith.addf %54, %56 : vector<2x512xf32>
    %58 = vector.extract_strided_slice %57 {offsets = [0, 0], sizes = [2, 128], strides = [1, 1]} : vector<2x512xf32> to vector<2x128xf32>
    %59 = arith.negf %58 : vector<2x128xf32>
    %60 = math.exp %59 : vector<2x128xf32>
    %cst_25 = arith.constant 1.000000e+00 : f32
    %61 = vector.broadcast %cst_25 : f32 to vector<2x128xf32>
    %62 = arith.addf %61, %60 : vector<2x128xf32>
    %63 = arith.divf %61, %62 : vector<2x128xf32>
    %64 = vector.extract_strided_slice %57 {offsets = [0, 128], sizes = [2, 128], strides = [1, 1]} : vector<2x512xf32> to vector<2x128xf32>
    %65 = arith.negf %64 : vector<2x128xf32>
    %66 = math.exp %65 : vector<2x128xf32>
    %cst_26 = arith.constant 1.000000e+00 : f32
    %67 = vector.broadcast %cst_26 : f32 to vector<2x128xf32>
    %68 = arith.addf %67, %66 : vector<2x128xf32>
    %69 = arith.divf %67, %68 : vector<2x128xf32>
    %70 = vector.extract_strided_slice %57 {offsets = [0, 256], sizes = [2, 128], strides = [1, 1]} : vector<2x512xf32> to vector<2x128xf32>
    %71 = math.tanh %70 : vector<2x128xf32>
    %72 = vector.extract_strided_slice %57 {offsets = [0, 384], sizes = [2, 128], strides = [1, 1]} : vector<2x512xf32> to vector<2x128xf32>
    %73 = arith.negf %72 : vector<2x128xf32>
    %74 = math.exp %73 : vector<2x128xf32>
    %cst_27 = arith.constant 1.000000e+00 : f32
    %75 = vector.broadcast %cst_27 : f32 to vector<2x128xf32>
    %76 = arith.addf %75, %74 : vector<2x128xf32>
    %77 = arith.divf %75, %76 : vector<2x128xf32>
    %78 = arith.mulf %69, %42 : vector<2x128xf32>
    %79 = arith.mulf %63, %71 : vector<2x128xf32>
    %80 = arith.addf %78, %79 : vector<2x128xf32>
    %81 = math.tanh %80 : vector<2x128xf32>
    %82 = arith.mulf %77, %81 : vector<2x128xf32>
    %83 = vector.extract_strided_slice %5 {offsets = [2, 0], sizes = [2, 1], strides = [1, 1]} : vector<16x1xf32> to vector<2x1xf32>
    %84 = vector.broadcast %83 : vector<2x1xf32> to vector<2x128xf32>
    %85 = arith.mulf %82, %84 : vector<2x128xf32>
    %86 = arith.addf %48, %85 : vector<2x128xf32>
    %87 = vector.extract_strided_slice %2 {offsets = [2, 0], sizes = [2, 128], strides = [1, 1]} : vector<16x128xf32> to vector<2x128xf32>
    %88 = vector.broadcast %83 : vector<2x1xf32> to vector<2x128xf32>
    %89 = arith.mulf %87, %88 : vector<2x128xf32>
    %90 = arith.addf %52, %89 : vector<2x128xf32>
    %91 = arith.addf %53, %83 : vector<2x1xf32>
    %92 = vector.extract_strided_slice %10 {offsets = [4, 0], sizes = [2, 512], strides = [1, 1]} : vector<16x512xf32> to vector<2x512xf32>
    %c0_28 = arith.constant 0 : index
    %c0_29 = arith.constant 0 : index
    %93 = vector.load %arg4[%c0_28, %c0_29] : memref<128x512xf32, #tpu.memory_space<vmem>>, vector<128x512xf32>
    %cst_30 = arith.constant dense<0.000000e+00> : vector<2x512xf32>
    %94 = tpu.matmul %82, %93, %cst_30 {dimension_numbers = #tpu.dot_dimension_numbers<[1], [0], [0], [1], [0, 0, 1, 1], [], []>} : vector<2x128xf32>, vector<128x512xf32>, vector<2x512xf32> -> vector<2x512xf32>
    %95 = arith.addf %92, %94 : vector<2x512xf32>
    %96 = vector.extract_strided_slice %95 {offsets = [0, 0], sizes = [2, 128], strides = [1, 1]} : vector<2x512xf32> to vector<2x128xf32>
    %97 = arith.negf %96 : vector<2x128xf32>
    %98 = math.exp %97 : vector<2x128xf32>
    %cst_31 = arith.constant 1.000000e+00 : f32
    %99 = vector.broadcast %cst_31 : f32 to vector<2x128xf32>
    %100 = arith.addf %99, %98 : vector<2x128xf32>
    %101 = arith.divf %99, %100 : vector<2x128xf32>
    %102 = vector.extract_strided_slice %95 {offsets = [0, 128], sizes = [2, 128], strides = [1, 1]} : vector<2x512xf32> to vector<2x128xf32>
    %103 = arith.negf %102 : vector<2x128xf32>
    %104 = math.exp %103 : vector<2x128xf32>
    %cst_32 = arith.constant 1.000000e+00 : f32
    %105 = vector.broadcast %cst_32 : f32 to vector<2x128xf32>
    %106 = arith.addf %105, %104 : vector<2x128xf32>
    %107 = arith.divf %105, %106 : vector<2x128xf32>
    %108 = vector.extract_strided_slice %95 {offsets = [0, 256], sizes = [2, 128], strides = [1, 1]} : vector<2x512xf32> to vector<2x128xf32>
    %109 = math.tanh %108 : vector<2x128xf32>
    %110 = vector.extract_strided_slice %95 {offsets = [0, 384], sizes = [2, 128], strides = [1, 1]} : vector<2x512xf32> to vector<2x128xf32>
    %111 = arith.negf %110 : vector<2x128xf32>
    %112 = math.exp %111 : vector<2x128xf32>
    %cst_33 = arith.constant 1.000000e+00 : f32
    %113 = vector.broadcast %cst_33 : f32 to vector<2x128xf32>
    %114 = arith.addf %113, %112 : vector<2x128xf32>
    %115 = arith.divf %113, %114 : vector<2x128xf32>
    %116 = arith.mulf %107, %80 : vector<2x128xf32>
    %117 = arith.mulf %101, %109 : vector<2x128xf32>
    %118 = arith.addf %116, %117 : vector<2x128xf32>
    %119 = math.tanh %118 : vector<2x128xf32>
    %120 = arith.mulf %115, %119 : vector<2x128xf32>
    %121 = vector.extract_strided_slice %5 {offsets = [4, 0], sizes = [2, 1], strides = [1, 1]} : vector<16x1xf32> to vector<2x1xf32>
    %122 = vector.broadcast %121 : vector<2x1xf32> to vector<2x128xf32>
    %123 = arith.mulf %120, %122 : vector<2x128xf32>
    %124 = arith.addf %86, %123 : vector<2x128xf32>
    %125 = vector.extract_strided_slice %2 {offsets = [4, 0], sizes = [2, 128], strides = [1, 1]} : vector<16x128xf32> to vector<2x128xf32>
    %126 = vector.broadcast %121 : vector<2x1xf32> to vector<2x128xf32>
    %127 = arith.mulf %125, %126 : vector<2x128xf32>
    %128 = arith.addf %90, %127 : vector<2x128xf32>
    %129 = arith.addf %91, %121 : vector<2x1xf32>
    %130 = vector.extract_strided_slice %10 {offsets = [6, 0], sizes = [2, 512], strides = [1, 1]} : vector<16x512xf32> to vector<2x512xf32>
    %c0_34 = arith.constant 0 : index
    %c0_35 = arith.constant 0 : index
    %131 = vector.load %arg4[%c0_34, %c0_35] : memref<128x512xf32, #tpu.memory_space<vmem>>, vector<128x512xf32>
    %cst_36 = arith.constant dense<0.000000e+00> : vector<2x512xf32>
    %132 = tpu.matmul %120, %131, %cst_36 {dimension_numbers = #tpu.dot_dimension_numbers<[1], [0], [0], [1], [0, 0, 1, 1], [], []>} : vector<2x128xf32>, vector<128x512xf32>, vector<2x512xf32> -> vector<2x512xf32>
    %133 = arith.addf %130, %132 : vector<2x512xf32>
    %134 = vector.extract_strided_slice %133 {offsets = [0, 0], sizes = [2, 128], strides = [1, 1]} : vector<2x512xf32> to vector<2x128xf32>
    %135 = arith.negf %134 : vector<2x128xf32>
    %136 = math.exp %135 : vector<2x128xf32>
    %cst_37 = arith.constant 1.000000e+00 : f32
    %137 = vector.broadcast %cst_37 : f32 to vector<2x128xf32>
    %138 = arith.addf %137, %136 : vector<2x128xf32>
    %139 = arith.divf %137, %138 : vector<2x128xf32>
    %140 = vector.extract_strided_slice %133 {offsets = [0, 128], sizes = [2, 128], strides = [1, 1]} : vector<2x512xf32> to vector<2x128xf32>
    %141 = arith.negf %140 : vector<2x128xf32>
    %142 = math.exp %141 : vector<2x128xf32>
    %cst_38 = arith.constant 1.000000e+00 : f32
    %143 = vector.broadcast %cst_38 : f32 to vector<2x128xf32>
    %144 = arith.addf %143, %142 : vector<2x128xf32>
    %145 = arith.divf %143, %144 : vector<2x128xf32>
    %146 = vector.extract_strided_slice %133 {offsets = [0, 256], sizes = [2, 128], strides = [1, 1]} : vector<2x512xf32> to vector<2x128xf32>
    %147 = math.tanh %146 : vector<2x128xf32>
    %148 = vector.extract_strided_slice %133 {offsets = [0, 384], sizes = [2, 128], strides = [1, 1]} : vector<2x512xf32> to vector<2x128xf32>
    %149 = arith.negf %148 : vector<2x128xf32>
    %150 = math.exp %149 : vector<2x128xf32>
    %cst_39 = arith.constant 1.000000e+00 : f32
    %151 = vector.broadcast %cst_39 : f32 to vector<2x128xf32>
    %152 = arith.addf %151, %150 : vector<2x128xf32>
    %153 = arith.divf %151, %152 : vector<2x128xf32>
    %154 = arith.mulf %145, %118 : vector<2x128xf32>
    %155 = arith.mulf %139, %147 : vector<2x128xf32>
    %156 = arith.addf %154, %155 : vector<2x128xf32>
    %157 = math.tanh %156 : vector<2x128xf32>
    %158 = arith.mulf %153, %157 : vector<2x128xf32>
    %159 = vector.extract_strided_slice %5 {offsets = [6, 0], sizes = [2, 1], strides = [1, 1]} : vector<16x1xf32> to vector<2x1xf32>
    %160 = vector.broadcast %159 : vector<2x1xf32> to vector<2x128xf32>
    %161 = arith.mulf %158, %160 : vector<2x128xf32>
    %162 = arith.addf %124, %161 : vector<2x128xf32>
    %163 = vector.extract_strided_slice %2 {offsets = [6, 0], sizes = [2, 128], strides = [1, 1]} : vector<16x128xf32> to vector<2x128xf32>
    %164 = vector.broadcast %159 : vector<2x1xf32> to vector<2x128xf32>
    %165 = arith.mulf %163, %164 : vector<2x128xf32>
    %166 = arith.addf %128, %165 : vector<2x128xf32>
    %167 = arith.addf %129, %159 : vector<2x1xf32>
    %168 = vector.extract_strided_slice %10 {offsets = [8, 0], sizes = [2, 512], strides = [1, 1]} : vector<16x512xf32> to vector<2x512xf32>
    %c0_40 = arith.constant 0 : index
    %c0_41 = arith.constant 0 : index
    %169 = vector.load %arg4[%c0_40, %c0_41] : memref<128x512xf32, #tpu.memory_space<vmem>>, vector<128x512xf32>
    %cst_42 = arith.constant dense<0.000000e+00> : vector<2x512xf32>
    %170 = tpu.matmul %158, %169, %cst_42 {dimension_numbers = #tpu.dot_dimension_numbers<[1], [0], [0], [1], [0, 0, 1, 1], [], []>} : vector<2x128xf32>, vector<128x512xf32>, vector<2x512xf32> -> vector<2x512xf32>
    %171 = arith.addf %168, %170 : vector<2x512xf32>
    %172 = vector.extract_strided_slice %171 {offsets = [0, 0], sizes = [2, 128], strides = [1, 1]} : vector<2x512xf32> to vector<2x128xf32>
    %173 = arith.negf %172 : vector<2x128xf32>
    %174 = math.exp %173 : vector<2x128xf32>
    %cst_43 = arith.constant 1.000000e+00 : f32
    %175 = vector.broadcast %cst_43 : f32 to vector<2x128xf32>
    %176 = arith.addf %175, %174 : vector<2x128xf32>
    %177 = arith.divf %175, %176 : vector<2x128xf32>
    %178 = vector.extract_strided_slice %171 {offsets = [0, 128], sizes = [2, 128], strides = [1, 1]} : vector<2x512xf32> to vector<2x128xf32>
    %179 = arith.negf %178 : vector<2x128xf32>
    %180 = math.exp %179 : vector<2x128xf32>
    %cst_44 = arith.constant 1.000000e+00 : f32
    %181 = vector.broadcast %cst_44 : f32 to vector<2x128xf32>
    %182 = arith.addf %181, %180 : vector<2x128xf32>
    %183 = arith.divf %181, %182 : vector<2x128xf32>
    %184 = vector.extract_strided_slice %171 {offsets = [0, 256], sizes = [2, 128], strides = [1, 1]} : vector<2x512xf32> to vector<2x128xf32>
    %185 = math.tanh %184 : vector<2x128xf32>
    %186 = vector.extract_strided_slice %171 {offsets = [0, 384], sizes = [2, 128], strides = [1, 1]} : vector<2x512xf32> to vector<2x128xf32>
    %187 = arith.negf %186 : vector<2x128xf32>
    %188 = math.exp %187 : vector<2x128xf32>
    %cst_45 = arith.constant 1.000000e+00 : f32
    %189 = vector.broadcast %cst_45 : f32 to vector<2x128xf32>
    %190 = arith.addf %189, %188 : vector<2x128xf32>
    %191 = arith.divf %189, %190 : vector<2x128xf32>
    %192 = arith.mulf %183, %156 : vector<2x128xf32>
    %193 = arith.mulf %177, %185 : vector<2x128xf32>
    %194 = arith.addf %192, %193 : vector<2x128xf32>
    %195 = math.tanh %194 : vector<2x128xf32>
    %196 = arith.mulf %191, %195 : vector<2x128xf32>
    %197 = vector.extract_strided_slice %5 {offsets = [8, 0], sizes = [2, 1], strides = [1, 1]} : vector<16x1xf32> to vector<2x1xf32>
    %198 = vector.broadcast %197 : vector<2x1xf32> to vector<2x128xf32>
    %199 = arith.mulf %196, %198 : vector<2x128xf32>
    %200 = arith.addf %162, %199 : vector<2x128xf32>
    %201 = vector.extract_strided_slice %2 {offsets = [8, 0], sizes = [2, 128], strides = [1, 1]} : vector<16x128xf32> to vector<2x128xf32>
    %202 = vector.broadcast %197 : vector<2x1xf32> to vector<2x128xf32>
    %203 = arith.mulf %201, %202 : vector<2x128xf32>
    %204 = arith.addf %166, %203 : vector<2x128xf32>
    %205 = arith.addf %167, %197 : vector<2x1xf32>
    %206 = vector.extract_strided_slice %10 {offsets = [10, 0], sizes = [2, 512], strides = [1, 1]} : vector<16x512xf32> to vector<2x512xf32>
    %c0_46 = arith.constant 0 : index
    %c0_47 = arith.constant 0 : index
    %207 = vector.load %arg4[%c0_46, %c0_47] : memref<128x512xf32, #tpu.memory_space<vmem>>, vector<128x512xf32>
    %cst_48 = arith.constant dense<0.000000e+00> : vector<2x512xf32>
    %208 = tpu.matmul %196, %207, %cst_48 {dimension_numbers = #tpu.dot_dimension_numbers<[1], [0], [0], [1], [0, 0, 1, 1], [], []>} : vector<2x128xf32>, vector<128x512xf32>, vector<2x512xf32> -> vector<2x512xf32>
    %209 = arith.addf %206, %208 : vector<2x512xf32>
    %210 = vector.extract_strided_slice %209 {offsets = [0, 0], sizes = [2, 128], strides = [1, 1]} : vector<2x512xf32> to vector<2x128xf32>
    %211 = arith.negf %210 : vector<2x128xf32>
    %212 = math.exp %211 : vector<2x128xf32>
    %cst_49 = arith.constant 1.000000e+00 : f32
    %213 = vector.broadcast %cst_49 : f32 to vector<2x128xf32>
    %214 = arith.addf %213, %212 : vector<2x128xf32>
    %215 = arith.divf %213, %214 : vector<2x128xf32>
    %216 = vector.extract_strided_slice %209 {offsets = [0, 128], sizes = [2, 128], strides = [1, 1]} : vector<2x512xf32> to vector<2x128xf32>
    %217 = arith.negf %216 : vector<2x128xf32>
    %218 = math.exp %217 : vector<2x128xf32>
    %cst_50 = arith.constant 1.000000e+00 : f32
    %219 = vector.broadcast %cst_50 : f32 to vector<2x128xf32>
    %220 = arith.addf %219, %218 : vector<2x128xf32>
    %221 = arith.divf %219, %220 : vector<2x128xf32>
    %222 = vector.extract_strided_slice %209 {offsets = [0, 256], sizes = [2, 128], strides = [1, 1]} : vector<2x512xf32> to vector<2x128xf32>
    %223 = math.tanh %222 : vector<2x128xf32>
    %224 = vector.extract_strided_slice %209 {offsets = [0, 384], sizes = [2, 128], strides = [1, 1]} : vector<2x512xf32> to vector<2x128xf32>
    %225 = arith.negf %224 : vector<2x128xf32>
    %226 = math.exp %225 : vector<2x128xf32>
    %cst_51 = arith.constant 1.000000e+00 : f32
    %227 = vector.broadcast %cst_51 : f32 to vector<2x128xf32>
    %228 = arith.addf %227, %226 : vector<2x128xf32>
    %229 = arith.divf %227, %228 : vector<2x128xf32>
    %230 = arith.mulf %221, %194 : vector<2x128xf32>
    %231 = arith.mulf %215, %223 : vector<2x128xf32>
    %232 = arith.addf %230, %231 : vector<2x128xf32>
    %233 = math.tanh %232 : vector<2x128xf32>
    %234 = arith.mulf %229, %233 : vector<2x128xf32>
    %235 = vector.extract_strided_slice %5 {offsets = [10, 0], sizes = [2, 1], strides = [1, 1]} : vector<16x1xf32> to vector<2x1xf32>
    %236 = vector.broadcast %235 : vector<2x1xf32> to vector<2x128xf32>
    %237 = arith.mulf %234, %236 : vector<2x128xf32>
    %238 = arith.addf %200, %237 : vector<2x128xf32>
    %239 = vector.extract_strided_slice %2 {offsets = [10, 0], sizes = [2, 128], strides = [1, 1]} : vector<16x128xf32> to vector<2x128xf32>
    %240 = vector.broadcast %235 : vector<2x1xf32> to vector<2x128xf32>
    %241 = arith.mulf %239, %240 : vector<2x128xf32>
    %242 = arith.addf %204, %241 : vector<2x128xf32>
    %243 = arith.addf %205, %235 : vector<2x1xf32>
    %244 = vector.extract_strided_slice %10 {offsets = [12, 0], sizes = [2, 512], strides = [1, 1]} : vector<16x512xf32> to vector<2x512xf32>
    %c0_52 = arith.constant 0 : index
    %c0_53 = arith.constant 0 : index
    %245 = vector.load %arg4[%c0_52, %c0_53] : memref<128x512xf32, #tpu.memory_space<vmem>>, vector<128x512xf32>
    %cst_54 = arith.constant dense<0.000000e+00> : vector<2x512xf32>
    %246 = tpu.matmul %234, %245, %cst_54 {dimension_numbers = #tpu.dot_dimension_numbers<[1], [0], [0], [1], [0, 0, 1, 1], [], []>} : vector<2x128xf32>, vector<128x512xf32>, vector<2x512xf32> -> vector<2x512xf32>
    %247 = arith.addf %244, %246 : vector<2x512xf32>
    %248 = vector.extract_strided_slice %247 {offsets = [0, 0], sizes = [2, 128], strides = [1, 1]} : vector<2x512xf32> to vector<2x128xf32>
    %249 = arith.negf %248 : vector<2x128xf32>
    %250 = math.exp %249 : vector<2x128xf32>
    %cst_55 = arith.constant 1.000000e+00 : f32
    %251 = vector.broadcast %cst_55 : f32 to vector<2x128xf32>
    %252 = arith.addf %251, %250 : vector<2x128xf32>
    %253 = arith.divf %251, %252 : vector<2x128xf32>
    %254 = vector.extract_strided_slice %247 {offsets = [0, 128], sizes = [2, 128], strides = [1, 1]} : vector<2x512xf32> to vector<2x128xf32>
    %255 = arith.negf %254 : vector<2x128xf32>
    %256 = math.exp %255 : vector<2x128xf32>
    %cst_56 = arith.constant 1.000000e+00 : f32
    %257 = vector.broadcast %cst_56 : f32 to vector<2x128xf32>
    %258 = arith.addf %257, %256 : vector<2x128xf32>
    %259 = arith.divf %257, %258 : vector<2x128xf32>
    %260 = vector.extract_strided_slice %247 {offsets = [0, 256], sizes = [2, 128], strides = [1, 1]} : vector<2x512xf32> to vector<2x128xf32>
    %261 = math.tanh %260 : vector<2x128xf32>
    %262 = vector.extract_strided_slice %247 {offsets = [0, 384], sizes = [2, 128], strides = [1, 1]} : vector<2x512xf32> to vector<2x128xf32>
    %263 = arith.negf %262 : vector<2x128xf32>
    %264 = math.exp %263 : vector<2x128xf32>
    %cst_57 = arith.constant 1.000000e+00 : f32
    %265 = vector.broadcast %cst_57 : f32 to vector<2x128xf32>
    %266 = arith.addf %265, %264 : vector<2x128xf32>
    %267 = arith.divf %265, %266 : vector<2x128xf32>
    %268 = arith.mulf %259, %232 : vector<2x128xf32>
    %269 = arith.mulf %253, %261 : vector<2x128xf32>
    %270 = arith.addf %268, %269 : vector<2x128xf32>
    %271 = math.tanh %270 : vector<2x128xf32>
    %272 = arith.mulf %267, %271 : vector<2x128xf32>
    %273 = vector.extract_strided_slice %5 {offsets = [12, 0], sizes = [2, 1], strides = [1, 1]} : vector<16x1xf32> to vector<2x1xf32>
    %274 = vector.broadcast %273 : vector<2x1xf32> to vector<2x128xf32>
    %275 = arith.mulf %272, %274 : vector<2x128xf32>
    %276 = arith.addf %238, %275 : vector<2x128xf32>
    %277 = vector.extract_strided_slice %2 {offsets = [12, 0], sizes = [2, 128], strides = [1, 1]} : vector<16x128xf32> to vector<2x128xf32>
    %278 = vector.broadcast %273 : vector<2x1xf32> to vector<2x128xf32>
    %279 = arith.mulf %277, %278 : vector<2x128xf32>
    %280 = arith.addf %242, %279 : vector<2x128xf32>
    %281 = arith.addf %243, %273 : vector<2x1xf32>
    %282 = vector.extract_strided_slice %10 {offsets = [14, 0], sizes = [2, 512], strides = [1, 1]} : vector<16x512xf32> to vector<2x512xf32>
    %c0_58 = arith.constant 0 : index
    %c0_59 = arith.constant 0 : index
    %283 = vector.load %arg4[%c0_58, %c0_59] : memref<128x512xf32, #tpu.memory_space<vmem>>, vector<128x512xf32>
    %cst_60 = arith.constant dense<0.000000e+00> : vector<2x512xf32>
    %284 = tpu.matmul %272, %283, %cst_60 {dimension_numbers = #tpu.dot_dimension_numbers<[1], [0], [0], [1], [0, 0, 1, 1], [], []>} : vector<2x128xf32>, vector<128x512xf32>, vector<2x512xf32> -> vector<2x512xf32>
    %285 = arith.addf %282, %284 : vector<2x512xf32>
    %286 = vector.extract_strided_slice %285 {offsets = [0, 0], sizes = [2, 128], strides = [1, 1]} : vector<2x512xf32> to vector<2x128xf32>
    %287 = arith.negf %286 : vector<2x128xf32>
    %288 = math.exp %287 : vector<2x128xf32>
    %cst_61 = arith.constant 1.000000e+00 : f32
    %289 = vector.broadcast %cst_61 : f32 to vector<2x128xf32>
    %290 = arith.addf %289, %288 : vector<2x128xf32>
    %291 = arith.divf %289, %290 : vector<2x128xf32>
    %292 = vector.extract_strided_slice %285 {offsets = [0, 128], sizes = [2, 128], strides = [1, 1]} : vector<2x512xf32> to vector<2x128xf32>
    %293 = arith.negf %292 : vector<2x128xf32>
    %294 = math.exp %293 : vector<2x128xf32>
    %cst_62 = arith.constant 1.000000e+00 : f32
    %295 = vector.broadcast %cst_62 : f32 to vector<2x128xf32>
    %296 = arith.addf %295, %294 : vector<2x128xf32>
    %297 = arith.divf %295, %296 : vector<2x128xf32>
    %298 = vector.extract_strided_slice %285 {offsets = [0, 256], sizes = [2, 128], strides = [1, 1]} : vector<2x512xf32> to vector<2x128xf32>
    %299 = math.tanh %298 : vector<2x128xf32>
    %300 = vector.extract_strided_slice %285 {offsets = [0, 384], sizes = [2, 128], strides = [1, 1]} : vector<2x512xf32> to vector<2x128xf32>
    %301 = arith.negf %300 : vector<2x128xf32>
    %302 = math.exp %301 : vector<2x128xf32>
    %cst_63 = arith.constant 1.000000e+00 : f32
    %303 = vector.broadcast %cst_63 : f32 to vector<2x128xf32>
    %304 = arith.addf %303, %302 : vector<2x128xf32>
    %305 = arith.divf %303, %304 : vector<2x128xf32>
    %306 = arith.mulf %297, %270 : vector<2x128xf32>
    %307 = arith.mulf %291, %299 : vector<2x128xf32>
    %308 = arith.addf %306, %307 : vector<2x128xf32>
    %309 = math.tanh %308 : vector<2x128xf32>
    %310 = arith.mulf %305, %309 : vector<2x128xf32>
    %311 = vector.extract_strided_slice %5 {offsets = [14, 0], sizes = [2, 1], strides = [1, 1]} : vector<16x1xf32> to vector<2x1xf32>
    %312 = vector.broadcast %311 : vector<2x1xf32> to vector<2x128xf32>
    %313 = arith.mulf %310, %312 : vector<2x128xf32>
    %314 = arith.addf %276, %313 : vector<2x128xf32>
    %315 = vector.extract_strided_slice %2 {offsets = [14, 0], sizes = [2, 128], strides = [1, 1]} : vector<16x128xf32> to vector<2x128xf32>
    %316 = vector.broadcast %311 : vector<2x1xf32> to vector<2x128xf32>
    %317 = arith.mulf %315, %316 : vector<2x128xf32>
    %318 = arith.addf %280, %317 : vector<2x128xf32>
    %319 = arith.addf %281, %311 : vector<2x1xf32>
    %320 = vector.broadcast %319 : vector<2x1xf32> to vector<2x128xf32>
    %321 = arith.divf %314, %320 : vector<2x128xf32>
    %c0_64 = arith.constant 0 : index
    %c0_65 = arith.constant 0 : index
    %c0_66 = arith.constant 0 : index
    %322 = vector.load %arg6[%c0_64, %c0_65, %c0_66] : memref<1x2x128xf32, #tpu.memory_space<vmem>>, vector<1x2x128xf32>
    %323 = vector.shape_cast %322 : vector<1x2x128xf32> to vector<2x128xf32>
    %324 = vector.shape_cast %321 : vector<2x128xf32> to vector<1x2x128xf32>
    tpu.vector_store %arg6[%c0_64, %c0_65, %c0_66], %324 {strides = array<i32>} : memref<1x2x128xf32, #tpu.memory_space<vmem>>, vector<1x2x128xf32>,
    %325 = vector.broadcast %319 : vector<2x1xf32> to vector<2x128xf32>
    %326 = arith.divf %318, %325 : vector<2x128xf32>
    %c0_67 = arith.constant 0 : index
    %c0_68 = arith.constant 0 : index
    %c0_69 = arith.constant 0 : index
    %327 = vector.load %arg7[%c0_67, %c0_68, %c0_69] : memref<1x2x128xf32, #tpu.memory_space<vmem>>, vector<1x2x128xf32>
    %328 = vector.shape_cast %327 : vector<1x2x128xf32> to vector<2x128xf32>
    %329 = vector.shape_cast %326 : vector<2x128xf32> to vector<1x2x128xf32>
    tpu.vector_store %arg7[%c0_67, %c0_68, %c0_69], %329 {strides = array<i32>} : memref<1x2x128xf32, #tpu.memory_space<vmem>>, vector<1x2x128xf32>,
    return
  }
  func.func @transform_0(%arg0: i32) -> (i32, i32, i32, i32) {
    %c0_i32 = arith.constant 0 : i32
    %c0_i32_0 = arith.constant 0 : i32
    %c0_i32_1 = arith.constant 0 : i32
    %c0_i32_2 = arith.constant 0 : i32
    return %arg0, %c0_i32, %c0_i32_0, %c0_i32_1 : i32, i32, i32, i32
  }
  func.func @transform_1(%arg0: i32) -> (i32, i32, i32, i32) {
    %c0_i32 = arith.constant 0 : i32
    %c0_i32_0 = arith.constant 0 : i32
    %c0_i32_1 = arith.constant 0 : i32
    %c0_i32_2 = arith.constant 0 : i32
    return %arg0, %c0_i32, %c0_i32_0, %c0_i32_1 : i32, i32, i32, i32
  }
  func.func @transform_2(%arg0: i32) -> (i32, i32) {
    %c0_i32 = arith.constant 0 : i32
    %c0_i32_0 = arith.constant 0 : i32
    %c0_i32_1 = arith.constant 0 : i32
    return %c0_i32, %c0_i32_0 : i32, i32
  }
  func.func @transform_3(%arg0: i32) -> (i32, i32) {
    %c0_i32 = arith.constant 0 : i32
    %c0_i32_0 = arith.constant 0 : i32
    %c0_i32_1 = arith.constant 0 : i32
    return %c0_i32, %c0_i32_0 : i32, i32
  }
  func.func @transform_4(%arg0: i32) -> (i32, i32) {
    %c0_i32 = arith.constant 0 : i32
    %c0_i32_0 = arith.constant 0 : i32
    %c0_i32_1 = arith.constant 0 : i32
    return %c0_i32, %c0_i32_0 : i32, i32
  }
  func.func @transform_5(%arg0: i32) -> (i32, i32, i32) {
    %c0_i32 = arith.constant 0 : i32
    %c0_i32_0 = arith.constant 0 : i32
    %c0_i32_1 = arith.constant 0 : i32
    return %arg0, %c0_i32, %c0_i32_0 : i32, i32, i32
  }
  func.func @transform_6(%arg0: i32) -> (i32, i32, i32) {
    %c0_i32 = arith.constant 0 : i32
    %c0_i32_0 = arith.constant 0 : i32
    %c0_i32_1 = arith.constant 0 : i32
    return %arg0, %c0_i32, %c0_i32_0 : i32, i32, i32
  }
}

module attributes {stable_mosaic.version = 11 : i64} {
  func.func @disc_kernel(%arg0: memref<2x128xf32, #tpu.memory_space<vmem>>, %arg1: memref<2x24x128xf32, #tpu.memory_space<vmem>>, %arg2: memref<2x24xf32, #tpu.memory_space<vmem>>, %arg3: memref<2x3x128xf32, #tpu.memory_space<vmem>>, %arg4: memref<128x128xf32, #tpu.memory_space<vmem>>, %arg5: memref<128x128xf32, #tpu.memory_space<vmem>>, %arg6: memref<1x1xf32, #tpu.memory_space<vmem>>, %arg7: memref<1x1xf32, #tpu.memory_space<vmem>>, %arg8: memref<2x24xf32, #tpu.memory_space<vmem>>, %arg9: memref<2x3xf32, #tpu.memory_space<vmem>>) attributes {dimension_semantics = [], scalar_prefetch = 0 : i64, scratch_operands = 0 : i64, tpu.core_type = #tpu.core_type<tc>} {
    %c0 = arith.constant 0 : index
    %c0_0 = arith.constant 0 : index
    %0 = vector.load %arg0[%c0, %c0_0] : memref<2x128xf32, #tpu.memory_space<vmem>>, vector<2x128xf32>
    %c0_1 = arith.constant 0 : index
    %c0_2 = arith.constant 0 : index
    %1 = vector.load %arg4[%c0_1, %c0_2] : memref<128x128xf32, #tpu.memory_space<vmem>>, vector<128x128xf32>
    %cst = arith.constant dense<0.000000e+00> : vector<2x128xf32>
    %2 = tpu.matmul %0, %1, %cst {dimension_numbers = #tpu.dot_dimension_numbers<[1], [0], [0], [1], [0, 0, 1, 1], [], []>} : vector<2x128xf32>, vector<128x128xf32>, vector<2x128xf32> -> vector<2x128xf32>
    %c0_3 = arith.constant 0 : index
    %c0_4 = arith.constant 0 : index
    %c0_5 = arith.constant 0 : index
    %3 = vector.load %arg1[%c0_3, %c0_4, %c0_5] : memref<2x24x128xf32, #tpu.memory_space<vmem>>, vector<2x24x128xf32>
    %4 = vector.shape_cast %2 : vector<2x128xf32> to vector<2x1x128xf32>
    %5 = vector.broadcast %4 : vector<2x1x128xf32> to vector<2x24x128xf32>
    %6 = arith.mulf %3, %5 : vector<2x24x128xf32>
    %cst_6 = arith.constant dense<0.000000e+00> : vector<2x24xf32>
    %7 = vector.multi_reduction <add>, %6, %cst_6 [2] : vector<2x24x128xf32> to vector<2x24xf32>
    %c0_7 = arith.constant 0 : index
    %c0_8 = arith.constant 0 : index
    %8 = vector.load %arg2[%c0_7, %c0_8] : memref<2x24xf32, #tpu.memory_space<vmem>>, vector<2x24xf32>
    %9 = arith.mulf %7, %8 : vector<2x24xf32>
    %c0_9 = arith.constant 0 : index
    %c0_10 = arith.constant 0 : index
    %10 = vector.load %arg6[%c0_9, %c0_10] : memref<1x1xf32, #tpu.memory_space<vmem>>, vector<1x1xf32>
    %11 = vector.broadcast %10 : vector<1x1xf32> to vector<2x24xf32>
    %12 = arith.addf %9, %11 : vector<2x24xf32>
    %c0_11 = arith.constant 0 : index
    %c0_12 = arith.constant 0 : index
    %13 = vector.load %arg8[%c0_11, %c0_12] : memref<2x24xf32, #tpu.memory_space<vmem>>, vector<2x24xf32>
    tpu.vector_store %arg8[%c0_11, %c0_12], %12 {strides = array<i32>} : memref<2x24xf32, #tpu.memory_space<vmem>>, vector<2x24xf32>,
    %c0_13 = arith.constant 0 : index
    %c0_14 = arith.constant 0 : index
    %14 = vector.load %arg5[%c0_13, %c0_14] : memref<128x128xf32, #tpu.memory_space<vmem>>, vector<128x128xf32>
    %cst_15 = arith.constant dense<0.000000e+00> : vector<2x128xf32>
    %15 = tpu.matmul %0, %14, %cst_15 {dimension_numbers = #tpu.dot_dimension_numbers<[1], [0], [0], [1], [0, 0, 1, 1], [], []>} : vector<2x128xf32>, vector<128x128xf32>, vector<2x128xf32> -> vector<2x128xf32>
    %c0_16 = arith.constant 0 : index
    %c0_17 = arith.constant 0 : index
    %c0_18 = arith.constant 0 : index
    %16 = vector.load %arg3[%c0_16, %c0_17, %c0_18] : memref<2x3x128xf32, #tpu.memory_space<vmem>>, vector<2x3x128xf32>
    %17 = vector.shape_cast %15 : vector<2x128xf32> to vector<2x1x128xf32>
    %18 = vector.broadcast %17 : vector<2x1x128xf32> to vector<2x3x128xf32>
    %19 = arith.mulf %16, %18 : vector<2x3x128xf32>
    %cst_19 = arith.constant dense<0.000000e+00> : vector<2x3xf32>
    %20 = vector.multi_reduction <add>, %19, %cst_19 [2] : vector<2x3x128xf32> to vector<2x3xf32>
    %c0_20 = arith.constant 0 : index
    %c0_21 = arith.constant 0 : index
    %21 = vector.load %arg7[%c0_20, %c0_21] : memref<1x1xf32, #tpu.memory_space<vmem>>, vector<1x1xf32>
    %22 = vector.broadcast %21 : vector<1x1xf32> to vector<2x3xf32>
    %23 = arith.addf %20, %22 : vector<2x3xf32>
    %c0_22 = arith.constant 0 : index
    %c0_23 = arith.constant 0 : index
    %24 = vector.load %arg9[%c0_22, %c0_23] : memref<2x3xf32, #tpu.memory_space<vmem>>, vector<2x3xf32>
    tpu.vector_store %arg9[%c0_22, %c0_23], %23 {strides = array<i32>} : memref<2x3xf32, #tpu.memory_space<vmem>>, vector<2x3xf32>,
    return
  }
}

</mosaic_0001>

<bundles_post_ra>
// kernel: pim_forward.3
= control target key start
LH: loop header
LB: loop body
LE: loop exit
PB: predicated region body
PF: predicated region fallthrough
CT: control target
= control target key end

     0   :  { %s966_s0 = inlined_call_operand.vmem [shape: f32[2,128], index: 0, kind: input, shape index: {}]   ;;  %s967_s1 = inlined_call_operand.vmem [shape: f32[2,24,128], index: 1, kind: input, shape index: {}]   ;;  %s968_s2 = inlined_call_operand.vmem [shape: f32[2,24], index: 2, kind: input, shape index: {}]   ;;  %s969_s3 = inlined_call_operand.vmem [shape: f32[2,3,128], index: 3, kind: input, shape index: {}]   ;;  %s970_s4 = inlined_call_operand.hbm [shape: f32[128,128], index: 4, kind: input, shape index: {}]   ;;  %s971_s5 = inlined_call_operand.hbm [shape: f32[128,128], index: 5, kind: input, shape index: {}]   ;;  %s972_s6 = inlined_call_operand.<no memory space> [shape: f32[1,1], index: 6, kind: input, shape index: {}]   ;;  %s973_s8 = inlined_call_operand.hbm [shape: f32[2,24], index: 8, kind: output, shape index: {0}]   ;;  %s974_s9 = inlined_call_operand.hbm [shape: f32[2,3], index: 9, kind: output, shape index: {1}]   ;;  %s975_s7 = inlined_call_operand.<no memory space> [shape: f32[1,1], index: 7, kind: input, shape index: {}]  }
   0x1   :  { %v15_v0 = vstv %s972_s6  ;;  %v17_v1 = vstv %s975_s7 }
   0x2   :  { %16 = vst [vmem:[#allocation2] sm:$0x1] %v15_v0  ;;  %18 = vst [vmem:[#allocation3] sm:$0x1] %v17_v1 }
   0x3   :  { %19 = vsyncpa [#allocation5], 0 }
   0x4   :  { %20 = vsyncpa [#allocation8], 0 }
   0x5   :  { %21 = vsyncpa [#allocation6], 0 }
   0x6   :  { %22 = vsyncpa [#allocation11], 0  ;;  %s781_s13 = smov [#allocation4]   ;;  %s685_s17 = scalar_lea.hbm %s970_s4, 2048 }
   0x7   :  { %s36_s14 = sshll.u32 %s781_s13, 4  ;;  %p686_p0 = scmp.ne.s32.totalorder %s970_s4, %s685_s17  ;;  %s37_s14 = int_to_ptr.vmem [resolvable:$true] %s36_s14 }
   0x8   :  { %p689_p1 = scmp.lt.u32.totalorder %s685_s17, %s970_s4 }
   0xa   :  { %p691_p2 = pnand %p689_p1, %p686_p0 }
   0xc   :  { %694 = shalt.err (!%p691_p2)
}
   0xd   :  { %s695_s7 = scalar_lea.vmem %s37_s14, 2048  ;;  %p700_p4 = scmp.lt.s32.totalorder %s37_s14, %s37_s14 }
   0xe   :  { %p696_p3 = scmp.ne.s32.totalorder %s37_s14, %s695_s7  ;;  %p701_p5 = scmp.lt.s32.totalorder %s695_s7, %s695_s7 }
  0x10   :  { %p702_p6 = por %p701_p5, %p700_p4 }
  0x12   :  { %p703_p7 = pnand %p702_p6, %p696_p3 }
  0x14   :  { %706 = shalt.err (!%p703_p7)
}
  0x15   :  { %s782_s21 = smov 128   ;;  %s783_s22 = smov 8  }
  0x16   :  { %42 = dma.hbm_to_vmem [thread:$0]  %s970_s4, 2048, %s37_s14, [#allocation5], %s782_s21, %s782_s21, %s783_s22  }
  0x17   :  { %s784_s25 = smov [#allocation7]   ;;  %s707_s29 = scalar_lea.hbm %s971_s5, 2048 }
  0x18   :  { %s48_s26 = sshll.u32 %s784_s25, 4  ;;  %p708_p8 = scmp.ne.s32.totalorder %s971_s5, %s707_s29  ;;  %s49_s26 = int_to_ptr.vmem [resolvable:$true] %s48_s26 }
  0x19   :  { %p711_p9 = scmp.lt.u32.totalorder %s707_s29, %s971_s5 }
  0x1b   :  { %p713_p10 = pnand %p711_p9, %p708_p8 }
  0x1d   :  { %716 = shalt.err (!%p713_p10)
}
  0x1e   :  { %s717_s13 = scalar_lea.vmem %s49_s26, 2048  ;;  %p722_p12 = scmp.lt.s32.totalorder %s49_s26, %s49_s26 }
  0x1f   :  { %p718_p11 = scmp.ne.s32.totalorder %s49_s26, %s717_s13  ;;  %p723_p13 = scmp.lt.s32.totalorder %s717_s13, %s717_s13 }
  0x21   :  { %p724_p0 = por %p723_p13, %p722_p12 }
  0x23   :  { %p725_p1 = pnand %p724_p0, %p718_p11 }
  0x25   :  { %728 = shalt.err (!%p725_p1)
}
  0x26   :  { %54 = dma.hbm_to_vmem [thread:$0]  %s971_s5, 2048, %s49_s26, [#allocation8], %s782_s21, %s782_s21, %s783_s22  }
  0x27   :  { %773 = dma.done.wait [#allocation5], 2048  }
  0x28   :  { %774 = vsyncadd [#allocation5], 4294965248 }
  0x29   :  { %775 = dma.done.wait [#allocation8], 2048  }
  0x2a   :  { %776 = vsyncadd [#allocation8], 4294965248  ;;  %v785_v2 = vmov 0.0|0.0   ;;  %vm786_vm0 = vmmov 0   ;;  %v787_v3 = vmov 0.0   ;;  %v788_v4 = vmov 0  }
  0x2b   :  { %624 = vmatprep.subr.bf16.mxu0 %v785_v2  ;;  %586 = vmatprep.mubr.msk.f32.mxu0 %vm786_vm0, %v787_v3  ;;  %v66_v5 = vld [vmem:[#allocation4] sm:$0xff]  ;;  %v67_v6 = vld [vmem:[#allocation4 + $0x8] sm:$0xff]  ;;  %v68_v7 = vld [vmem:[#allocation4 + $0x10] sm:$0xff]  ;;  %v162_v8 = vlaneseq  ;;  %v789_v62 = vmov 1966171168   ;;  %vm455_vm1 = vcmask 1042432  }
  0x2c   :  { %648 = vmatprep.subr.bf16.mxu1 %v785_v2  ;;  %621 = vmatprep.mubr.msk.f32.mxu1 %vm786_vm0, %v787_v3  ;;  %v625_v9 = vpack.c.bf16 %v67_v6, %v66_v5  ;;  %v69_v10 = vld [vmem:[#allocation4 + $0x18] sm:$0xff]  ;;  %v70_v12 = vld [vmem:[#allocation4 + $0x20] sm:$0xff]  ;;  %v71_v13 = vld [vmem:[#allocation4 + $0x28] sm:$0xff]  ;;  %v160_v63 = vunpack.c.l.s4 %v789_v62  ;;  %vm327_vm2 = vcmask 1041409   ;;  %vm486_vm3 = vcmask 17408  }
  0x2d   :  { %683 = vset.pattern.permute.xlu0 %v788_v4  ;;  %684 = vset.pattern.permute.xlu1 %v788_v4  ;;  %v628_v11 = vpack.c.bf16 %v69_v10, %v68_v7  ;;  %v876_v14 = vshrl.u32 %v162_v8, 7  ;;  %v332_v15 = vld [vmem:[#allocation7] sm:$0xff]  ;;  %v333_v16 = vld [vmem:[#allocation7 + $0x8] sm:$0xff]  ;;  %v334_v17 = vld [vmem:[#allocation7 + $0x10] sm:$0xff]  ;;  %v631_v19 = vpack.c.bf16 %v71_v13, %v70_v12 }
  0x2e   :  { %626 = vmatpush3.bf16.msra.mxu0 %v625_v9  ;;  %v335_v18 = vld [vmem:[#allocation7 + $0x18] sm:$0xff]  ;;  %v649_v20 = vpack.c.bf16 %v333_v16, %v332_v15  ;;  %v72_v21 = vld [vmem:[#allocation4 + $0x30] sm:$0xff]  ;;  %v336_v25 = vld [vmem:[#allocation7 + $0x20] sm:$0xff]  ;;  %v161_v0 = vunpack.c.0.s8 %v160_v63 }
  0x2f   :  { %627 = vmatprep.subr.bf16.mxu0 %v785_v2  ;;  %v73_v22 = vld [vmem:[#allocation4 + $0x38] sm:$0xff]  ;;  %v880_v23 = vsub.s32 0, %v876_v14  ;;  %v652_v24 = vpack.c.bf16 %v335_v18, %v334_v17  ;;  %v337_v26 = vld [vmem:[#allocation7 + $0x28] sm:$0xff]  ;;  %v74_v30 = vld [vmem:[#allocation4 + $0x40] sm:$0xff]  ;;  %v228_v36 = vsub.s32 1, %v876_v14 }
  0x30   :  { %650 = vmatpush3.bf16.msra.mxu1 %v649_v20  ;;  %v634_v27 = vpack.c.bf16 %v73_v22, %v72_v21  ;;  %v209_v28 = vld [vmem:[%s968_s2] sm:$0x3]  ;;  %v75_v31 = vld [vmem:[#allocation4 + $0x48] sm:$0xff]  ;;  %v655_v33 = vpack.c.bf16 %v337_v26, %v336_v25  ;;  %v338_v34 = vld [vmem:[#allocation7 + $0x30] sm:$0xff]  ;;  %v164_v1 = vsub.s32 %v161_v0, %v876_v14 }
  0x31   :  { %651 = vmatprep.subr.bf16.mxu1 %v785_v2  ;;  %v518_v29 = vld [vmem:[#allocation2] ss:$0 sm:$0xff]  ;;  %v214_v32 = vrot.slane %v209_v28, %v880_v23  ;;  %v637_v37 = vpack.c.bf16 %v75_v31, %v74_v30  ;;  %v76_v38 = vld [vmem:[#allocation4 + $0x50] sm:$0xff]  ;;  %v340_v41 = vld [vmem:[#allocation7 + $0x40] sm:$0xff]  ;;  %v892_v43 = vrot.slane %v209_v28, %v228_v36 }
  0x32   :  { %629 = vmatpush3.bf16.msra.mxu0 %v628_v11  ;;  %260 = vperm.xlu0 %683, %v518_v29   ;;  %v339_v35 = vld [vmem:[#allocation7 + $0x38] sm:$0xff]  ;;  %v341_v42 = vld [vmem:[#allocation7 + $0x48] sm:$0xff]  ;;  %v78_v45 = vld [vmem:[#allocation4 + $0x60] sm:$0xff] }
  0x33   :  { %630 = vmatprep.subr.bf16.mxu0 %v785_v2  ;;  %216 = vbcast.lane.b32.xlu1 %v214_v32, 256  ;;  %v77_v39 = vld [vmem:[#allocation4 + $0x58] sm:$0xff]  ;;  %v658_v40 = vpack.c.bf16 %v339_v35, %v338_v34  ;;  %v79_v46 = vld [vmem:[#allocation4 + $0x68] sm:$0xff]  ;;  %v661_v47 = vpack.c.bf16 %v341_v42, %v340_v41  ;;  %v342_v48 = vld [vmem:[#allocation7 + $0x50] sm:$0xff] }
  0x34   :  { %653 = vmatpush3.bf16.msra.mxu1 %v652_v24  ;;  %v640_v44 = vpack.c.bf16 %v77_v39, %v76_v38  ;;  %v343_v49 = vld [vmem:[#allocation7 + $0x58] sm:$0xff]  ;;  %v643_v50 = vpack.c.bf16 %v79_v46, %v78_v45  ;;  %v80_v51 = vld [vmem:[#allocation4 + $0x70] sm:$0xff]  ;;  %v344_v54 = vld [vmem:[#allocation7 + $0x60] sm:$0xff] }
  0x35   :  { %654 = vmatprep.subr.bf16.mxu1 %v785_v2  ;;  %v81_v52 = vld [vmem:[#allocation4 + $0x78] sm:$0xff]  ;;  %v664_v53 = vpack.c.bf16 %v343_v49, %v342_v48  ;;  %v345_v55 = vld [vmem:[#allocation7 + $0x68] sm:$0xff]  ;;  %v346_v58 = vld [vmem:[#allocation7 + $0x70] sm:$0xff] }
  0x36   :  { %632 = vmatpush3.bf16.msra.mxu0 %v631_v19  ;;  %v646_v56 = vpack.c.bf16 %v81_v52, %v80_v51  ;;  %v667_v57 = vpack.c.bf16 %v345_v55, %v344_v54  ;;  %v347_v59 = vld [vmem:[#allocation7 + $0x78] sm:$0xff]  ;;  %v153_v17 = vld [vmem:[%s967_s1 + $0x8] sm:$0xff]  ;;  %v154_v24 = vld [vmem:[%s967_s1 + $0x10] sm:$0xff] }
  0x37   :  { %633 = vmatprep.subr.bf16.mxu0 %v785_v2  ;;  %220 = vbcast.lane.b32.xlu1 %v214_v32, 264  ;;  %v65_v60 = vld [vmem:[%s966_s0] sm:$0x3]  ;;  %v670_v61 = vpack.c.bf16 %v347_v59, %v346_v58  ;;  %v157_v26 = vld [vmem:[%s967_s1 + $0x28] sm:$0xff] }
  0x38   :  { %656 = vmatpush3.bf16.msra.mxu1 %v655_v33  ;;  %v152_v9 = vld [vmem:[%s967_s1] sm:$0xff] }
  0x39   :  { %657 = vmatprep.subr.bf16.mxu1 %v785_v2  ;;  %v156_v20 = vld [vmem:[%s967_s1 + $0x20] sm:$0xff] }
  0x3a   :  { %635 = vmatpush3.bf16.msra.mxu0 %v634_v27  ;;  %v519_v29 = vld [vmem:[#allocation3] ss:$0 sm:$0xff]  ;;  %v419_v33 = vld [vmem:[%s969_s3 + $0x4] sm:$0x7] }
  0x3b   :  { %636 = vmatprep.subr.bf16.mxu0 %v785_v2  ;;  %231 = vbcast.lane.b32.xlu1 %v892_v43, 256  ;;  %v418_v35 = vld [vmem:[%s969_s3] sm:$0x7]  ;;  %s790_s3 = smov [#allocation10]  }
  0x3c   :  { %659 = vmatpush3.bf16.msra.mxu1 %v658_v40  ;;  %s504_s29 = sshll.u32 %s790_s3, 4  ;;  %s505_s29 = int_to_ptr.vmem [resolvable:$true] %s504_s29 }
  0x3d   :  { %660 = vmatprep.subr.bf16.mxu1 %v785_v2  ;;  %s729_s30 = scalar_lea.vmem %s505_s29, 32  ;;  %p734_p3 = scmp.lt.s32.totalorder %s505_s29, %s505_s29 }
  0x3e   :  { %638 = vmatpush3.bf16.msra.mxu0 %v637_v37  ;;  %p730_p2 = scmp.ne.s32.totalorder %s505_s29, %s729_s30  ;;  %p735_p4 = scmp.lt.s32.totalorder %s729_s30, %s729_s30 }
  0x3f   :  { %639 = vmatprep.subr.bf16.mxu0 %v785_v2  ;;  %235 = vbcast.lane.b32.xlu1 %v892_v43, 264 }
  0x40   :  { %662 = vmatpush3.bf16.msra.mxu1 %v661_v47  ;;  %p736_p5 = por %p735_p4, %p734_p3 }
  0x41   :  { %663 = vmatprep.subr.bf16.mxu1 %v785_v2 }
  0x42   :  { %641 = vmatpush3.bf16.msra.mxu0 %v640_v44  ;;  %p737_p6 = pnand %p736_p5, %p730_p2 }
  0x43   :  { %642 = vmatprep.subr.bf16.mxu0 %v785_v2  ;;  %224 = vbcast.lane.b32.xlu1 %v214_v32, 272 }
  0x44   :  { %665 = vmatpush3.bf16.msra.mxu1 %v664_v53 }
  0x45   :  { %666 = vmatprep.subr.bf16.mxu1 %v785_v2 }
  0x46   :  { %644 = vmatpush3.bf16.msra.mxu0 %v643_v50 }
  0x47   :  { %645 = vmatprep.subr.bf16.mxu0 %v785_v2 }
  0x48   :  { %668 = vmatpush3.bf16.msra.mxu1 %v667_v57 }
  0x49   :  { %669 = vmatprep.subr.bf16.mxu1 %v785_v2  ;;  %v155_v2 = vld [vmem:[%s967_s1 + $0x18] sm:$0xff] }
  0x4a   :  { %647 = vmatpush3.bf16.msra.mxu0 %v646_v56 }
  0x4c   :  { %671 = vmatpush3.bf16.msra.mxu1 %v670_v61 }
  0x4d   :  { %587 = vmatmul.mubr.f32.vlgmr.msra.gmra.mrb[0].mxu0 %v65_v60 }
  0x4f   :  { %622 = vmatmul.mubr.f32.vlgmr.msra.gmra.mrb[0].mxu1 %v65_v60 }
  0xa5   :  { %v217_v40 = vpop.permute.xlu1 %216 }
  0xa9   :  { %v221_v41 = vpop.permute.xlu1 %220 }
  0xad   :  { %v232_v42 = vpop.permute.xlu1 %231 }
  0xb1   :  { %v261_v44 = vpop.permute.xlu0 %260 }
 0x120   :  { %v148_v3 = vpop.f32.mrb[0].mxu0 }
 0x121   :  { %v165_v4 = vrot.slane %v148_v3, %v164_v1  ;;  %v588_v5 = vpop.f32.mrb[1].mxu0 }
 0x122   :  { %v414_v12 = vpop.f32.mrb[0].mxu1 }
 0x123   :  { %v166_v6 = vcombine.high %v165_v4, %v165_v4  ;;  %v173_v7 = vrot.slane %v165_v4, %v164_v1  ;;  %v623_v16 = vpop.f32.mrb[1].mxu1  ;;  %v427_v18 = vrot.slane %v414_v12, %v164_v1 }
 0x125   :  { %v180_v10 = vrot.slane %v166_v6, %v164_v1  ;;  %v184_v11 = vrot.slane %v173_v7, %v880_v23  ;;  %v435_v21 = vrot.slane %v427_v18, %v164_v1  ;;  %v428_v30 = vcombine.high %v427_v18, %v427_v18 }
 0x127   :  { %v191_v13 = vmul.f32 %v184_v11, %v152_v9  ;;  %v188_v15 = vrot.slane %v180_v10, %v880_v23  ;;  %v192_v22 = vmul.f32 %v184_v11, %v153_v17  ;;  %v193_v27 = vmul.f32 %v184_v11, %v154_v24 }
 0x128   :  { %v442_v31 = vrot.slane %v428_v30, %v164_v1  ;;  %v446_v34 = vrot.slane %v435_v21, %v880_v23  ;;  %v294_v1 = vand.u32 127, %v162_v8 }
 0x129   :  { %197 = vadd.xlane.f32.xlu0 %v191_v13  ;;  %v194_v19 = vmul.f32 %v188_v15, %v155_v2  ;;  %v195_v25 = vmul.f32 %v188_v15, %v156_v20  ;;  %v196_v28 = vmul.f32 %v188_v15, %v157_v26 }
 0x12a   :  { %v450_v32 = vrot.slane %v442_v31, %v880_v23  ;;  %v453_v37 = vmul.f32 %v446_v34, %v418_v35  ;;  %v297_v4 = vsub.s32 %v294_v1, %v876_v14 }
 0x12b   :  { %203 = vadd.xlane.f32.xlu1 %v194_v19 }
 0x12c   :  { %v454_v36 = vmul.f32 %v450_v32, %v419_v33  ;;  %v456_v39 = vsel %vm455_vm1, %v453_v37, 0.0 }
 0x12d   :  { %199 = vadd.xlane.f32.xlu0 %v192_v22 }
 0x12e   :  { %v459_v38 = vsel %vm455_vm1, %v454_v36, 0.0 }
 0x12f   :  { %205 = vadd.xlane.f32.xlu1 %v195_v25 }
 0x131   :  { %201 = vadd.xlane.f32.xlu0 %v193_v27 }
 0x133   :  { %207 = vadd.xlane.f32.xlu1 %v196_v28 }
 0x144   :  { %239 = vbcast.lane.b32.xlu1 %v892_v43, 272  ;;  %v236_v43 = vpop.permute.xlu1 %235 }
 0x147   :  { %469 = vperm.xlu0 %683, %v519_v29  }
 0x148   :  { %v225_v45 = vpop.permute.xlu1 %224 }
 0x166   :  { %460 = vadd.xlane.f32.xlu0 %v459_v38 }
 0x168   :  { %457 = vadd.xlane.f32.xlu1 %v456_v39 }
 0x1b6   :  { %v198_v46 = vpop.xlane.xlu0 %197 }
 0x1b7   :  { %v247_v47 = vmul.f32 %v217_v40, %v198_v46 }
 0x1b8   :  { %v204_v23 = vpop.xlane.xlu1 %203 }
 0x1b9   :  { %v263_v48 = vadd.f32 %v261_v44, %v247_v47  ;;  %v250_v49 = vmul.f32 %v232_v42, %v204_v23 }
 0x1ba   :  { %v200_v50 = vpop.xlane.xlu0 %199 }
 0x1bb   :  { %v248_v51 = vmul.f32 %v221_v41, %v200_v50  ;;  %276 = vperm.xlu1 %684, %v263_v48   ;;  %v266_v53 = vadd.f32 %v261_v44, %v250_v49 }
 0x1bc   :  { %v206_v52 = vpop.xlane.xlu1 %205 }
 0x1bd   :  { %v264_v54 = vadd.f32 %v261_v44, %v248_v51  ;;  %v251_v55 = vmul.f32 %v236_v43, %v206_v52 }
 0x1be   :  { %v202_v56 = vpop.xlane.xlu0 %201 }
 0x1bf   :  { %279 = vperm.xlu0 %683, %v264_v54   ;;  %285 = vperm.xlu1 %684, %v266_v53   ;;  %v267_v58 = vadd.f32 %v261_v44, %v251_v55  ;;  %v249_v59 = vmul.f32 %v225_v45, %v202_v56 }
 0x1c0   :  { %v208_v57 = vpop.xlane.xlu1 %207 }
 0x1c1   :  { %v265_v61 = vadd.f32 %v261_v44, %v249_v59 }
 0x1c3   :  { %288 = vperm.xlu1 %684, %v267_v58  }
 0x1c4   :  { %v240_v60 = vpop.permute.xlu1 %239 }
 0x1c5   :  { %v252_v62 = vmul.f32 %v240_v60, %v208_v57 }
 0x1c6   :  { %v470_v0 = vpop.permute.xlu0 %469 }
 0x1c7   :  { %v268_v63 = vadd.f32 %v261_v44, %v252_v62  ;;  %282 = vperm.xlu1 %684, %v265_v61  }
 0x1c9   :  { %291 = vperm.xlu0 %683, %v268_v63  }
 0x1f3   :  { %v461_v3 = vpop.xlane.xlu0 %460 }
 0x1f4   :  { %v473_v5 = vadd.f32 %v470_v0, %v461_v3 }
 0x1f5   :  { %v458_v6 = vpop.xlane.xlu1 %457 }
 0x1f6   :  { %v472_v7 = vadd.f32 %v470_v0, %v458_v6  ;;  %v483_v9 = vrot.slane %v473_v5, %v297_v4 }
 0x1f8   :  { %v479_v10 = vrot.slane %v472_v7, %v297_v4 }
 0x1fa   :  { %v484_v11 = vsel %vm327_vm2, %v483_v9, %v479_v10 }
 0x1fb   :  { %487 = vst.msk [vmem:[#allocation10] sm:$0x3] %vm486_vm3, %v484_v11 }
 0x1fc   :  { %740 = shalt.err (!%p737_p6)
}
 0x1fd   :  { %s741_s12 = scalar_lea.hbm %s974_s9, 32 }
 0x1fe   :  { %p742_p7 = scmp.ne.s32.totalorder %s974_s9, %s741_s12  ;;  %p745_p8 = scmp.lt.u32.totalorder %s741_s12, %s974_s9 }
 0x200   :  { %p747_p9 = pnand %p745_p8, %p742_p7 }
 0x202   :  { %750 = shalt.err (!%p747_p9)
}
 0x203   :  { %507 = dma.vmem_to_hbm [thread:$0]  %s505_s29, 32, %s974_s9, [#allocation11]   ;;  %v299_v2 = vadd.s32 4294967288, %v294_v1  ;;  %v306_v13 = vadd.s32 4294967280, %v294_v1  ;;  %vm304_vm4 = vcmask 130112   ;;  %vm311_vm5 = vcmask 195712  }
 0x204   :  { %s791_s9 = smov [#allocation9]   ;;  %vm330_vm6 = vcmask 189440  }
 0x205   :  { %v302_v15 = vsub.s32 %v299_v2, %v876_v14  ;;  %v309_v18 = vsub.s32 %v306_v13, %v876_v14  ;;  %s494_s16 = sshll.u32 %s791_s9, 4  ;;  %s495_s16 = int_to_ptr.vmem [resolvable:$true] %s494_s16 }
 0x206   :  { %s751_s17 = scalar_lea.vmem %s495_s16, 32  ;;  %p756_p11 = scmp.lt.s32.totalorder %s495_s16, %s495_s16 }
 0x207   :  { %p752_p10 = scmp.ne.s32.totalorder %s495_s16, %s751_s17  ;;  %p757_p12 = scmp.lt.s32.totalorder %s751_s17, %s751_s17 }
 0x209   :  { %p758_p13 = por %p757_p12, %p756_p11 }
 0x20b   :  { %p759_p0 = pnand %p758_p13, %p752_p10 }
 0x23a   :  { %v277_v8 = vpop.permute.xlu1 %276 }
 0x23b   :  { %v298_v24 = vrot.slane %v277_v8, %v297_v4 }
 0x23e   :  { %v286_v12 = vpop.permute.xlu1 %285  ;;  %v280_v17 = vpop.permute.xlu0 %279 }
 0x23f   :  { %v303_v19 = vrot.slane %v280_v17, %v302_v15  ;;  %v316_v25 = vrot.slane %v286_v12, %v297_v4 }
 0x241   :  { %v305_v28 = vsel %vm304_vm4, %v303_v19, %v298_v24 }
 0x242   :  { %v289_v16 = vpop.permute.xlu1 %288 }
 0x243   :  { %v320_v20 = vrot.slane %v289_v16, %v302_v15 }
 0x245   :  { %v321_v29 = vsel %vm304_vm4, %v320_v20, %v316_v25 }
 0x246   :  { %v283_v21 = vpop.permute.xlu1 %282 }
 0x247   :  { %v310_v22 = vrot.slane %v283_v21, %v309_v18 }
 0x248   :  { %v292_v26 = vpop.permute.xlu0 %291 }
 0x249   :  { %v325_v27 = vrot.slane %v292_v26, %v309_v18  ;;  %v312_v30 = vsel %vm311_vm5, %v310_v22, %v305_v28 }
 0x24b   :  { %v326_v31 = vsel %vm311_vm5, %v325_v27, %v321_v29 }
 0x24c   :  { %v328_v14 = vsel %vm327_vm2, %v326_v31, %v312_v30 }
 0x24d   :  { %331 = vst.msk [vmem:[#allocation9] sm:$0x3] %vm330_vm6, %v328_v14 }
 0x24e   :  { %762 = shalt.err (!%p759_p0)
}
 0x24f   :  { %s763_s19 = scalar_lea.hbm %s973_s8, 32 }
 0x250   :  { %p764_p1 = scmp.ne.s32.totalorder %s973_s8, %s763_s19  ;;  %p767_p2 = scmp.lt.u32.totalorder %s763_s19, %s973_s8 }
 0x252   :  { %p769_p3 = pnand %p767_p2, %p764_p1 }
 0x254   :  { %772 = shalt.err (!%p769_p3)
}
 0x255   :  { %497 = dma.vmem_to_hbm [thread:$0]  %s495_s16, 32, %s973_s8, [#allocation6]  }
 0x256   :  { %777 = dma.done.wait [#allocation6], 32  }
 0x257   :  { %778 = vsyncadd [#allocation6], 4294967264 }
 0x258   :  { %779 = dma.done.wait [#allocation11], 32  }
 0x259   :  { %780 = vsyncadd [#allocation11], 4294967264 }
 0x25a   :  { %514 = vsyncpa [#allocation5], 1 }
 0x25b   :  { %515 = vsyncpa [#allocation8], 1 }
 0x25c   :  { %516 = vsyncpa [#allocation6], 1 }
 0x25d   :  { %517 = vsyncpa [#allocation11], 1 }

// kernel: pim_forward.2
= control target key start
LH: loop header
LB: loop body
LE: loop exit
PB: predicated region body
PF: predicated region fallthrough
CT: control target
= control target key end

     0   :  { %12 = vsyncpa [#allocation3], 0  ;;  %s4164_s0 = inlined_call_operand.vmem [shape: f32[3,8,2,128], index: 0, kind: input, shape index: {}]   ;;  %s4165_s1 = inlined_call_operand.vmem [shape: f32[3,8,2,1], index: 1, kind: input, shape index: {}]   ;;  %s4166_s2 = inlined_call_operand.hbm [shape: f32[128,512], index: 2, kind: input, shape index: {}]   ;;  %s4167_s3 = inlined_call_operand.hbm [shape: f32[128,512], index: 3, kind: input, shape index: {}]   ;;  %s4168_s4 = inlined_call_operand.hbm [shape: f32[1,512], index: 4, kind: input, shape index: {}]   ;;  %s4169_s5 = inlined_call_operand.vmem [shape: f32[3,2,128], index: 5, kind: output, shape index: {0}]   ;;  %s4170_s6 = inlined_call_operand.vmem [shape: f32[3,2,128], index: 6, kind: output, shape index: {1}]  }
   0x1   :  { %13 = vsyncpa [#allocation5], 0  ;;  %s3465_s21 = smov 0  }
   0x2 LB: > { %s3471_s22 = sadd.s32 4294967295, %s3419_s21   ;;  %p2517_p0 = scmp.ge.s32.totalorder %s3419_s21, 1  ;;  %s3419_s21 = sphi %s3465_s21, %s19_s21  }
   0x3   : > { %p191_p1 = scmp.lt.s32.totalorder %s3419_s21, 4  ;;  %p4171_p2 = scmp.eq.s32.totalorder %s3471_s22, 0 }
   0x4   : > { %s3421_s24 = smov [#allocation4]   ;;  %s3422_s26 = smov [#allocation2]  }
   0x5   : > { %p3476_p3 = pnand %p2517_p0, %p191_p1  ;;  %s216_s25 = sshll.u32 %s3421_s24, 4  ;;  %s217_s25 = int_to_ptr.vmem [resolvable:$true] %s216_s25 }
   0x6   : > { %s203_s27 = sshll.u32 %s3422_s26, 4  ;;  %s3423_s29 = smov [#allocation6]   ;;  %s3488_s27 = int_to_ptr.vmem [resolvable:$true] %s203_s27 }
   0x7   : > { %s4180_s23 = scalar_select %p3476_p3, 1, 0 }
   0x8   : > { %p3148_p4 = pneg %p3476_p3  ;;  %s230_s30 = sshll.u32 %s3423_s29, 4  ;;  %s3490_s30 = int_to_ptr.vmem [resolvable:$true] %s230_s30 }
   0x9   : > { %s3321_s9 = scalar_lea.hbm %s4167_s3, 8192 }
   0xa   : > { %p3484_p5 = pnand %p4171_p2, %p3148_p4  ;;  %p3322_p6 = scmp.ne.s32.totalorder %s4167_s3, %s3321_s9 }
   0xb   : > { %p3328_p10 = scmp.lt.u32.totalorder %s3321_s9, %s4167_s3 }
   0xc   : > { %p3500_p7 = pneg %p3484_p5 }
   0xe   : > { %p3324_p8 = pnand %p3500_p7, %p3322_p6 }
  0x10   : > { %p3325_p9 = pneg %p3324_p8 }
  0x12   : > { %p3330_p11 = pnand %p3328_p10, %p3325_p9 }
  0x14   : > { %3333 = shalt.err (!%p3330_p11)
}
  0x15   : > { %s3334_s15 = scalar_lea.vmem %s217_s25, 8192  ;;  %p3342_p1 = scmp.lt.s32.totalorder %s217_s25, %s217_s25 }
  0x16   : > { %p3335_p12 = scmp.ne.s32.totalorder %s217_s25, %s3334_s15  ;;  %p3343_p4 = scmp.lt.s32.totalorder %s3334_s15, %s3334_s15 }
  0x18   : > { %p3337_p13 = pnand %p3335_p12, %p3500_p7  ;;  %p3344_p2 = por %p3343_p4, %p3342_p1 }
  0x1a   : > { %p3338_p0 = pneg %p3337_p13 }
  0x1c   : > { %p3345_p3 = pnand %p3344_p2, %p3338_p0 }
  0x1e   : > { %3348 = shalt.err (!%p3345_p3)
}
  0x1f   : > { %s3424_s16 = smov 512   ;;  %s3425_s17 = smov 32  }
  0x20   : > { %3154 = dma.hbm_to_vmem [thread:$0]  (!%p3484_p5), %s4167_s3, 8192, %s217_s25, [#allocation5], %s3424_s16, %s3424_s16, %s3425_s17  }
  0x21   : > { %s3349_s26 = scalar_lea.hbm %s4166_s2, 8192 }
  0x22   : > { %p3350_p6 = scmp.ne.s32.totalorder %s4166_s2, %s3349_s26  ;;  %p3356_p8 = scmp.lt.u32.totalorder %s3349_s26, %s4166_s2 }
  0x24   : > { %p3352_p2 = pnand %p3350_p6, %p3500_p7 }
  0x26   : > { %p3353_p3 = pneg %p3352_p2 }
  0x28   : > { %p3358_p9 = pnand %p3356_p8, %p3353_p3 }
  0x2a   : > { %3361 = shalt.err (!%p3358_p9)
}
  0x2b   : > { %s3362_s25 = scalar_lea.vmem %s3488_s27, 8192  ;;  %p3370_p13 = scmp.lt.s32.totalorder %s3488_s27, %s3488_s27 }
  0x2c   : > { %p3363_p10 = scmp.ne.s32.totalorder %s3488_s27, %s3362_s25  ;;  %p3371_p0 = scmp.lt.s32.totalorder %s3362_s25, %s3362_s25 }
  0x2e   : > { %p3365_p11 = pnand %p3363_p10, %p3500_p7  ;;  %p3372_p1 = por %p3371_p0, %p3370_p13 }
  0x30   : > { %p3366_p12 = pneg %p3365_p11 }
  0x32   : > { %p3373_p4 = pnand %p3372_p1, %p3366_p12 }
  0x34   : > { %3376 = shalt.err (!%p3373_p4)
}
  0x35   : > { %3151 = dma.hbm_to_vmem [thread:$0]  (!%p3484_p5), %s4166_s2, 8192, %s3488_s27, [#allocation3], %s3424_s16, %s3424_s16, %s3425_s17  }
  0x36   : > { %s3377_s15 = scalar_lea.hbm %s4168_s4, 64 }
  0x37   : > { %p3378_p6 = scmp.ne.s32.totalorder %s4168_s4, %s3377_s15  ;;  %p3384_p8 = scmp.lt.u32.totalorder %s3377_s15, %s4168_s4 }
  0x39   : > { %p3380_p2 = pnand %p3378_p6, %p3500_p7 }
  0x3b   : > { %p3381_p3 = pneg %p3380_p2 }
  0x3d   : > { %p3386_p9 = pnand %p3384_p8, %p3381_p3 }
  0x3f   : > { %3389 = shalt.err (!%p3386_p9)
}
  0x40   : > { %s3390_s27 = scalar_lea.vmem %s3490_s30, 64  ;;  %p3398_p13 = scmp.lt.s32.totalorder %s3490_s30, %s3490_s30 }
  0x41   : > { %p3391_p10 = scmp.ne.s32.totalorder %s3490_s30, %s3390_s27  ;;  %p3399_p0 = scmp.lt.s32.totalorder %s3390_s27, %s3390_s27 }
  0x43   : > { %p3393_p11 = pnand %p3391_p10, %p3500_p7  ;;  %p3400_p1 = por %p3399_p0, %p3398_p13 }
  0x45   : > { %p3394_p12 = pneg %p3393_p11 }
  0x47   : > { %p3401_p4 = pnand %p3400_p1, %p3394_p12 }
  0x49   : > { %3404 = shalt.err (!%p3401_p4)
}
  0x4a   : > { %3157 = dma.hbm_to_vmem [thread:$0]  (!%p3484_p5), %s4168_s4, 64, %s3490_s30, [#allocation5]  }
  0x4b   : > { %p4183_p6 = scmp.ne.s32.totalorder %s4180_s23, 0 }
  0x4d   : > { %259 = sbr.rel (%p4183_p6) target bundleno = 2253 (0x8cd), region = 40 }
  0x54   : > { %p4184_p2 = scmp.eq.s32.totalorder %s3471_s22, 0 }
  0x56   : > { %3410 = dma.done.wait (%p4184_p2), [#allocation3], 8192   ;;  %p4185_p7 = pmov %p4184_p2 }
  0x57   : > { %p4186_p3 = pmov %p4184_p2 }
  0x58   : > { %3412 = vsyncadd (%p4185_p7), [#allocation3], 4294959104 }
  0x59   : > { %3414 = dma.done.wait (%p4186_p3), [#allocation5], 8256   ;;  %p4187_p8 = pmov %p4184_p2 }
  0x5a   : > { %v4173_v0 = vmov 0.0   ;;  %v3427_v1 = vmov 0   ;;  %v340_v2 = vld [vmem:[#allocation2 + $0x8] sm:$0xff]  ;;  %v342_v4 = vld [vmem:[#allocation2 + $0x18] sm:$0xff]  ;;  %v339_v7 = vld [vmem:[#allocation2] sm:$0xff]  ;;  %p305_p5 = scmp.lt.s32.totalorder %s3471_s22, 2 }
  0x5b   : > { %3416 = vsyncadd (%p4187_p8), [#allocation5], 4294959040  ;;  %533 = vmatprep.mubr.f32.mxu0 %v4173_v0  ;;  %610 = vmatprep.mubr.f32.mxu1 %v4173_v0  ;;  %v344_v3 = vld [vmem:[#allocation2 + $0x28] sm:$0xff]  ;;  %v346_v6 = vld [vmem:[#allocation2 + $0x38] sm:$0xff] }
  0x5c   : > { %3182 = vset.pattern.permute.xlu1 %v3427_v1  ;;  %3181 = vset.pattern.permute.xlu0 %v3427_v1  ;;  %v2560_v5 = vpack.c.bf16 %v344_v3, %v340_v2  ;;  %v343_v8 = vld [vmem:[#allocation2 + $0x20] sm:$0xff]  ;;  %v2592_v9 = vpack.c.bf16 %v346_v6, %v342_v4  ;;  %v341_v11 = vld [vmem:[#allocation2 + $0x10] sm:$0xff]  ;;  %v348_v13 = vld [vmem:[#allocation2 + $0x48] sm:$0xff]  ;;  %s4200_s22 = smov (!%p305_p5, %s3471_s22), 2  ;;  %v405_v1 = vlaneseq  ;;  %v3428_v2 = vmov 1983009808  }
  0x5d   : > { %v2562_v10 = vpack.c.bf16 %v343_v8, %v339_v7  ;;  %v345_v12 = vld [vmem:[#allocation2 + $0x30] sm:$0xff]  ;;  %v352_v15 = vld [vmem:[#allocation2 + $0x68] sm:$0xff]  ;;  %v350_v16 = vld [vmem:[#allocation2 + $0x58] sm:$0xff]  ;;  %s2558_s23 = sshll.u32 %s4200_s22, 4  ;;  %v436_v3 = vunpack.c.l.s4 %v3428_v2  ;;  %s2530_s8 = sshll.u32 %s4200_s22, 1 }
  0x5e   : > { %2561 = vmatprep.subr.bf16.mxu0 %v2560_v5  ;;  %v2594_v14 = vpack.c.bf16 %v345_v12, %v341_v11  ;;  %v354_v17 = vld [vmem:[#allocation2 + $0x78] sm:$0xff]  ;;  %2593 = vmatprep.subr.bf16.mxu1 %v2592_v9  ;;  %v2564_v18 = vpack.c.bf16 %v352_v15, %v348_v13  ;;  %v347_v20 = vld [vmem:[#allocation2 + $0x40] sm:$0xff]  ;;  %v349_v22 = vld [vmem:[#allocation2 + $0x50] sm:$0xff]  ;;  %s3586_s12 = scalar_lea.vmem %s4164_s0, %s2558_s23  ;;  %s3648_s7 = scalar_lea.vmem %s4165_s1, %s2558_s23 }
  0x5f   : > { %2563 = vmatpush1.bf16.msra.mxu0 %v2562_v10  ;;  %v2596_v19 = vpack.c.bf16 %v354_v17, %v350_v16  ;;  %v351_v21 = vld [vmem:[#allocation2 + $0x60] sm:$0xff]  ;;  %v353_v24 = vld [vmem:[#allocation2 + $0x70] sm:$0xff]  ;;  %v356_v25 = vld [vmem:[#allocation2 + $0x88] sm:$0xff]  ;;  %v3588_v17 = vshrl.u32 %v405_v1, 7  ;;  %s322_s10 = scalar_lea.vmem %s4170_s6, %s2530_s8  ;;  %s318_s14 = scalar_lea.vmem %s4169_s5, %s2530_s8 }
  0x60   : > { %2595 = vmatpush1.bf16.msra.mxu1 %v2594_v14  ;;  %v2566_v23 = vpack.c.bf16 %v351_v21, %v347_v20  ;;  %v360_v26 = vld [vmem:[#allocation2 + $0xa8] sm:$0xff]  ;;  %2565 = vmatprep.subr.bf16.mxu0 %v2564_v18  ;;  %v2598_v27 = vpack.c.bf16 %v353_v24, %v349_v22  ;;  %v358_v29 = vld [vmem:[#allocation2 + $0x98] sm:$0xff]  ;;  %v355_v31 = vld [vmem:[#allocation2 + $0x80] sm:$0xff]  ;;  %v437_v18 = vunpack.c.0.s8 %v436_v3 }
  0x61   : > { %2597 = vmatprep.subr.bf16.mxu1 %v2596_v19  ;;  %v2568_v28 = vpack.c.bf16 %v360_v26, %v356_v25  ;;  %v362_v30 = vld [vmem:[#allocation2 + $0xb8] sm:$0xff]  ;;  %v359_v33 = vld [vmem:[#allocation2 + $0xa0] sm:$0xff]  ;;  %v357_v34 = vld [vmem:[#allocation2 + $0x90] sm:$0xff] }
  0x62   : > { %v2600_v32 = vpack.c.bf16 %v362_v30, %v358_v29  ;;  %v361_v35 = vld [vmem:[#allocation2 + $0xb0] sm:$0xff]  ;;  %v2570_v36 = vpack.c.bf16 %v359_v33, %v355_v31  ;;  %v364_v37 = vld [vmem:[#allocation2 + $0xc8] sm:$0xff]  ;;  %v366_v39 = vld [vmem:[#allocation2 + $0xd8] sm:$0xff] }
  0x63   : > { %2567 = vmatpush1.bf16.msra.mxu0 %v2566_v23  ;;  %v368_v38 = vld [vmem:[#allocation2 + $0xe8] sm:$0xff]  ;;  %v2602_v40 = vpack.c.bf16 %v361_v35, %v357_v34  ;;  %v370_v42 = vld [vmem:[#allocation2 + $0xf8] sm:$0xff]  ;;  %v363_v43 = vld [vmem:[#allocation2 + $0xc0] sm:$0xff] }
  0x64   : > { %2599 = vmatpush1.bf16.msra.mxu1 %v2598_v27  ;;  %2569 = vmatprep.subr.bf16.mxu0 %v2568_v28  ;;  %v2572_v41 = vpack.c.bf16 %v368_v38, %v364_v37  ;;  %v367_v44 = vld [vmem:[#allocation2 + $0xe0] sm:$0xff]  ;;  %v2604_v45 = vpack.c.bf16 %v370_v42, %v366_v39  ;;  %v365_v46 = vld [vmem:[#allocation2 + $0xd0] sm:$0xff]  ;;  %v372_v48 = vld [vmem:[#allocation2 + $0x108] sm:$0xff] }
  0x65   : > { %2601 = vmatprep.subr.bf16.mxu1 %v2600_v32  ;;  %v369_v47 = vld [vmem:[#allocation2 + $0xf0] sm:$0xff]  ;;  %v376_v49 = vld [vmem:[#allocation2 + $0x128] sm:$0xff]  ;;  %v374_v50 = vld [vmem:[#allocation2 + $0x118] sm:$0xff]  ;;  %v2574_v52 = vpack.c.bf16 %v367_v44, %v363_v43 }
  0x66   : > { %v378_v51 = vld [vmem:[#allocation2 + $0x138] sm:$0xff]  ;;  %v2606_v53 = vpack.c.bf16 %v369_v47, %v365_v46  ;;  %v2576_v54 = vpack.c.bf16 %v376_v49, %v372_v48  ;;  %v371_v55 = vld [vmem:[#allocation2 + $0x100] sm:$0xff]  ;;  %v373_v57 = vld [vmem:[#allocation2 + $0x110] sm:$0xff] }
  0x67   : > { %2571 = vmatpush1.bf16.msra.mxu0 %v2570_v36  ;;  %v375_v56 = vld [vmem:[#allocation2 + $0x120] sm:$0xff]  ;;  %v2608_v58 = vpack.c.bf16 %v378_v51, %v374_v50  ;;  %v377_v59 = vld [vmem:[#allocation2 + $0x130] sm:$0xff]  ;;  %v380_v60 = vld [vmem:[#allocation2 + $0x148] sm:$0xff]  ;;  %v3595_v36 = vsub.s32 %v437_v18, %v3588_v17 }
  0x68   : > { %2603 = vmatpush1.bf16.msra.mxu1 %v2602_v40  ;;  %2573 = vmatprep.subr.bf16.mxu0 %v2572_v41  ;;  %v384_v61 = vld [vmem:[#allocation2 + $0x168] sm:$0xff]  ;;  %v382_v62 = vld [vmem:[#allocation2 + $0x158] sm:$0xff]  ;;  %v2578_v4 = vpack.c.bf16 %v375_v56, %v371_v55  ;;  %v2610_v5 = vpack.c.bf16 %v377_v59, %v373_v57  ;;  %v379_v7 = vld [vmem:[#allocation2 + $0x140] sm:$0xff] }
  0x69   : > { %2605 = vmatprep.subr.bf16.mxu1 %v2604_v45  ;;  %v386_v63 = vld [vmem:[#allocation2 + $0x178] sm:$0xff]  ;;  %v2580_v6 = vpack.c.bf16 %v384_v61, %v380_v60  ;;  %v383_v8 = vld [vmem:[#allocation2 + $0x160] sm:$0xff]  ;;  %v381_v9 = vld [vmem:[#allocation2 + $0x150] sm:$0xff] }
  0x6a   : > { %v2612_v10 = vpack.c.bf16 %v386_v63, %v382_v62  ;;  %v385_v11 = vld [vmem:[#allocation2 + $0x170] sm:$0xff]  ;;  %v388_v12 = vld [vmem:[#allocation2 + $0x188] sm:$0xff]  ;;  %v390_v14 = vld [vmem:[#allocation2 + $0x198] sm:$0xff]  ;;  %v2582_v19 = vpack.c.bf16 %v383_v8, %v379_v7 }
  0x6b   : > { %2575 = vmatpush1.bf16.msra.mxu0 %v2574_v52  ;;  %v392_v13 = vld [vmem:[#allocation2 + $0x1a8] sm:$0xff]  ;;  %v394_v15 = vld [vmem:[#allocation2 + $0x1b8] sm:$0xff]  ;;  %v387_v16 = vld [vmem:[#allocation2 + $0x180] sm:$0xff]  ;;  %v2614_v23 = vpack.c.bf16 %v385_v11, %v381_v9 }
  0x6c   : > { %2607 = vmatpush1.bf16.msra.mxu1 %v2606_v53  ;;  %2577 = vmatprep.subr.bf16.mxu0 %v2576_v54  ;;  %v391_v20 = vld [vmem:[#allocation2 + $0x1a0] sm:$0xff]  ;;  %v389_v21 = vld [vmem:[#allocation2 + $0x190] sm:$0xff]  ;;  %v2584_v24 = vpack.c.bf16 %v392_v13, %v388_v12  ;;  %v396_v25 = vld [vmem:[#allocation2 + $0x1c8] sm:$0xff]  ;;  %v2616_v28 = vpack.c.bf16 %v394_v15, %v390_v14 }
  0x6d   : > { %2609 = vmatprep.subr.bf16.mxu1 %v2608_v58  ;;  %v393_v22 = vld [vmem:[#allocation2 + $0x1b0] sm:$0xff]  ;;  %v323_v26 = vld [vmem:[%s3586_s12] sm:$0x3]  ;;  %v324_v27 = vld [vmem:[%s3586_s12 + $0x2] sm:$0x3]  ;;  %v2586_v37 = vpack.c.bf16 %v391_v20, %v387_v16 }
  0x6e   : > { %v400_v29 = vld [vmem:[#allocation2 + $0x1e8] sm:$0xff]  ;;  %v325_v30 = vld [vmem:[%s3586_s12 + $0x4] sm:$0x3]  ;;  %v326_v31 = vld [vmem:[%s3586_s12 + $0x6] sm:$0x3]  ;;  %v433_v34 = vcombine.low %v323_v26, %v324_v27  ;;  %v2618_v38 = vpack.c.bf16 %v393_v22, %v389_v21 }
  0x6f   : > { %2579 = vmatpush1.bf16.msra.mxu0 %v2578_v4  ;;  %v398_v32 = vld [vmem:[#allocation2 + $0x1d8] sm:$0xff]  ;;  %v434_v35 = vcombine.low %v325_v30, %v326_v31  ;;  %v2588_v39 = vpack.c.bf16 %v400_v29, %v396_v25  ;;  %v395_v40 = vld [vmem:[#allocation2 + $0x1c0] sm:$0xff]  ;;  %v397_v42 = vld [vmem:[#allocation2 + $0x1d0] sm:$0xff] }
  0x70   : > { %2611 = vmatpush1.bf16.msra.mxu1 %v2610_v5  ;;  %2581 = vmatprep.subr.bf16.mxu0 %v2580_v6  ;;  %v402_v33 = vld [vmem:[#allocation2 + $0x1f8] sm:$0xff]  ;;  %v399_v41 = vld [vmem:[#allocation2 + $0x1e0] sm:$0xff]  ;;  %v401_v44 = vld [vmem:[#allocation2 + $0x1f0] sm:$0xff]  ;;  %v441_v47 = vrot.slane %v433_v34, %v3595_v36 }
  0x71   : > { %2613 = vmatprep.subr.bf16.mxu1 %v2612_v10  ;;  %v2620_v43 = vpack.c.bf16 %v402_v33, %v398_v32  ;;  %v624_v45 = vld [vmem:[#allocation4 + $0x8] sm:$0xff]  ;;  %v448_v48 = vrot.slane %v434_v35, %v3595_v36  ;;  %v626_v49 = vld [vmem:[#allocation4 + $0x18] sm:$0xff]  ;;  %v2590_v51 = vpack.c.bf16 %v399_v41, %v395_v40  ;;  %v2622_v52 = vpack.c.bf16 %v401_v44, %v397_v42  ;;  %v623_v54 = vld [vmem:[#allocation4] sm:$0xff] }
  0x72   : > { %v628_v46 = vld [vmem:[#allocation4 + $0x28] sm:$0xff]  ;;  %v630_v50 = vld [vmem:[#allocation4 + $0x38] sm:$0xff]  ;;  %v627_v55 = vld [vmem:[#allocation4 + $0x20] sm:$0xff] }
  0x73   : > { %2583 = vmatpush1.bf16.msra.mxu0 %v2582_v19  ;;  %v3599_v53 = vpack.c.bf16 %v628_v46, %v624_v45  ;;  %v625_v56 = vld [vmem:[#allocation4 + $0x10] sm:$0xff]  ;;  %v3601_v57 = vpack.c.bf16 %v630_v50, %v626_v49  ;;  %v632_v59 = vld [vmem:[#allocation4 + $0x48] sm:$0xff]  ;;  %v449_v61 = vcombine.low %v441_v47, %v448_v48  ;;  %v634_v62 = vld [vmem:[#allocation4 + $0x58] sm:$0xff]  ;;  %v3603_v1 = vpack.c.bf16 %v627_v55, %v623_v54 }
  0x74   : > { %2615 = vmatpush1.bf16.msra.mxu1 %v2614_v23  ;;  %2585 = vmatprep.subr.bf16.mxu0 %v2584_v24  ;;  %v629_v58 = vld [vmem:[#allocation4 + $0x30] sm:$0xff]  ;;  %v636_v60 = vld [vmem:[#allocation4 + $0x68] sm:$0xff]  ;;  %v638_v63 = vld [vmem:[#allocation4 + $0x78] sm:$0xff] }
  0x75   : > { %2617 = vmatprep.subr.bf16.mxu1 %v2616_v28  ;;  %v3606_v2 = vpack.c.bf16 %v629_v58, %v625_v56  ;;  %v3608_v3 = vpack.c.bf16 %v636_v60, %v632_v59  ;;  %v631_v4 = vld [vmem:[#allocation4 + $0x40] sm:$0xff]  ;;  %v633_v6 = vld [vmem:[#allocation4 + $0x50] sm:$0xff]  ;;  %v3611_v7 = vpack.c.bf16 %v638_v63, %v634_v62  ;;  %v640_v9 = vld [vmem:[#allocation4 + $0x88] sm:$0xff] }
  0x76   : > { %v635_v5 = vld [vmem:[#allocation4 + $0x60] sm:$0xff]  ;;  %v637_v8 = vld [vmem:[#allocation4 + $0x70] sm:$0xff]  ;;  %v644_v10 = vld [vmem:[#allocation4 + $0xa8] sm:$0xff] }
  0x77   : > { %2587 = vmatpush1.bf16.msra.mxu0 %v2586_v37  ;;  %v642_v11 = vld [vmem:[#allocation4 + $0x98] sm:$0xff]  ;;  %v3614_v13 = vpack.c.bf16 %v635_v5, %v631_v4  ;;  %v3618_v14 = vpack.c.bf16 %v637_v8, %v633_v6  ;;  %v3620_v15 = vpack.c.bf16 %v644_v10, %v640_v9  ;;  %v639_v16 = vld [vmem:[#allocation4 + $0x80] sm:$0xff]  ;;  %v641_v19 = vld [vmem:[#allocation4 + $0x90] sm:$0xff] }
  0x78   : > { %2619 = vmatpush1.bf16.msra.mxu1 %v2618_v38  ;;  %2589 = vmatprep.subr.bf16.mxu0 %v2588_v39  ;;  %v646_v12 = vld [vmem:[#allocation4 + $0xb8] sm:$0xff]  ;;  %v643_v18 = vld [vmem:[#allocation4 + $0xa0] sm:$0xff]  ;;  %v645_v21 = vld [vmem:[#allocation4 + $0xb0] sm:$0xff] }
  0x79   : > { %2621 = vmatprep.subr.bf16.mxu1 %v2620_v43  ;;  %v3623_v20 = vpack.c.bf16 %v646_v12, %v642_v11  ;;  %v648_v22 = vld [vmem:[#allocation4 + $0xc8] sm:$0xff]  ;;  %v650_v24 = vld [vmem:[#allocation4 + $0xd8] sm:$0xff]  ;;  %v647_v26 = vld [vmem:[#allocation4 + $0xc0] sm:$0xff]  ;;  %v3628_v27 = vpack.c.bf16 %v643_v18, %v639_v16  ;;  %v3632_v31 = vpack.c.bf16 %v645_v21, %v641_v19 }
  0x7a   : > { %v652_v23 = vld [vmem:[#allocation4 + $0xe8] sm:$0xff]  ;;  %v654_v25 = vld [vmem:[#allocation4 + $0xf8] sm:$0xff]  ;;  %v651_v28 = vld [vmem:[#allocation4 + $0xe0] sm:$0xff] }
  0x7b   : > { %2591 = vmatpush1.bf16.msra.mxu0 %v2590_v51  ;;  %v649_v29 = vld [vmem:[#allocation4 + $0xd0] sm:$0xff]  ;;  %v3634_v32 = vpack.c.bf16 %v652_v23, %v648_v22  ;;  %v656_v33 = vld [vmem:[#allocation4 + $0x108] sm:$0xff]  ;;  %v3639_v37 = vpack.c.bf16 %v654_v25, %v650_v24  ;;  %v658_v42 = vld [vmem:[#allocation4 + $0x118] sm:$0xff]  ;;  %v3651_v45 = vpack.c.bf16 %v651_v28, %v647_v26 }
  0x7c   : > { %2623 = vmatpush1.bf16.msra.mxu1 %v2622_v52  ;;  %2625 = vmatprep.subr.bf16.mxu0 %v3599_v53  ;;  %v653_v30 = vld [vmem:[#allocation4 + $0xf0] sm:$0xff]  ;;  %v327_v34 = vld [vmem:[%s3586_s12 + $0x8] sm:$0x3]  ;;  %v328_v35 = vld [vmem:[%s3586_s12 + $0xa] sm:$0x3] }
  0x7d   : > { %2657 = vmatprep.subr.bf16.mxu1 %v3601_v57  ;;  %v660_v38 = vld [vmem:[#allocation4 + $0x128] sm:$0xff]  ;;  %v450_v41 = vcombine.low %v327_v34, %v328_v35  ;;  %v662_v43 = vld [vmem:[#allocation4 + $0x138] sm:$0xff]  ;;  %v655_v46 = vld [vmem:[#allocation4 + $0x100] sm:$0xff]  ;;  %v3656_v48 = vpack.c.bf16 %v653_v30, %v649_v29 }
  0x7e   : > { %534 = vmatmul.mubr.f32.vlgmr.msra.gmra.mrb[0].mxu0 %v449_v61  ;;  %v329_v39 = vld [vmem:[%s3586_s12 + $0xc] sm:$0x3]  ;;  %v330_v40 = vld [vmem:[%s3586_s12 + $0xe] sm:$0x3]  ;;  %v3658_v49 = vpack.c.bf16 %v660_v38, %v656_v33  ;;  %v659_v50 = vld [vmem:[#allocation4 + $0x120] sm:$0xff]  ;;  %v3665_v55 = vpack.c.bf16 %v662_v43, %v658_v42 }
  0x7f   : > { %611 = vmatmul.mubr.f32.vlgmr.msra.gmra.mrb[0].mxu1 %v449_v61  ;;  %2627 = vmatpush1.bf16.msra.mxu0 %v3603_v1  ;;  %v451_v44 = vcombine.low %v329_v39, %v330_v40  ;;  %v458_v47 = vrot.slane %v450_v41, %v3595_v36  ;;  %v657_v51 = vld [vmem:[#allocation4 + $0x110] sm:$0xff]  ;;  %v3662_v54 = vld [vmem:[%s3648_s7 + $0x6] sm:$0x3]  ;;  %v664_v58 = vld [vmem:[#allocation4 + $0x148] sm:$0xff]  ;;  %v3669_v63 = vpack.c.bf16 %v659_v50, %v655_v46 }
  0x80   : > { %2659 = vmatpush1.bf16.msra.mxu1 %v3606_v2  ;;  %2629 = vmatprep.subr.bf16.mxu0 %v3608_v3  ;;  %v661_v56 = vld [vmem:[#allocation4 + $0x130] sm:$0xff]  ;;  %v668_v59 = vld [vmem:[#allocation4 + $0x168] sm:$0xff]  ;;  %v666_v60 = vld [vmem:[#allocation4 + $0x158] sm:$0xff] }
  0x81   : > { %2661 = vmatprep.subr.bf16.mxu1 %v3611_v7  ;;  %539 = vmatprep.mubr.f32.mxu0 %v4173_v0  ;;  %v465_v52 = vrot.slane %v451_v44, %v3595_v36  ;;  %v670_v61 = vld [vmem:[#allocation4 + $0x178] sm:$0xff]  ;;  %v3673_v4 = vpack.c.bf16 %v661_v56, %v657_v51  ;;  %v3675_v5 = vpack.c.bf16 %v668_v59, %v664_v58  ;;  %v663_v6 = vld [vmem:[#allocation4 + $0x140] sm:$0xff]  ;;  %v665_v9 = vld [vmem:[#allocation4 + $0x150] sm:$0xff] }
  0x82   : > { %616 = vmatprep.mubr.f32.mxu1 %v4173_v0  ;;  %1497 = vperm.xlu1 %3182, %v3662_v54   ;;  %v667_v8 = vld [vmem:[#allocation4 + $0x160] sm:$0xff]  ;;  %v3678_v10 = vpack.c.bf16 %v670_v61, %v666_v60  ;;  %v669_v11 = vld [vmem:[#allocation4 + $0x170] sm:$0xff]  ;;  %v672_v12 = vld [vmem:[#allocation4 + $0x188] sm:$0xff] }
  0x83   : > { %2631 = vmatpush1.bf16.msra.mxu0 %v3614_v13  ;;  %v466_v62 = vcombine.low %v458_v47, %v465_v52  ;;  %v676_v16 = vld [vmem:[#allocation4 + $0x1a8] sm:$0xff]  ;;  %v674_v18 = vld [vmem:[#allocation4 + $0x198] sm:$0xff]  ;;  %v3682_v21 = vld [vmem:[%s3648_s7] sm:$0x3]  ;;  %v3685_v22 = vpack.c.bf16 %v667_v8, %v663_v6  ;;  %v3690_v23 = vpack.c.bf16 %v669_v11, %v665_v9  ;;  %v407_v8 = vsub.s32 0, %v3588_v17 }
  0x84   : > { %2663 = vmatpush1.bf16.msra.mxu1 %v3618_v14  ;;  %2633 = vmatprep.subr.bf16.mxu0 %v3620_v15  ;;  %v678_v19 = vld [vmem:[#allocation4 + $0x1b8] sm:$0xff]  ;;  %v3692_v24 = vpack.c.bf16 %v676_v16, %v672_v12  ;;  %v671_v25 = vld [vmem:[#allocation4 + $0x180] sm:$0xff]  ;;  %v673_v28 = vld [vmem:[#allocation4 + $0x190] sm:$0xff]  ;;  %v411_v11 = vsub.s32 1, %v3588_v17  ;;  %v415_v12 = vsub.s32 2, %v3588_v17  ;;  %v419_v16 = vsub.s32 3, %v3588_v17 }
  0x85   : > { %2665 = vmatprep.subr.bf16.mxu1 %v3623_v20  ;;  %540 = vmatmul.mubr.f32.gmra.mrb[2].mxu0 %v466_v62  ;;  %v675_v26 = vld [vmem:[#allocation4 + $0x1a0] sm:$0xff]  ;;  %v3695_v29 = vpack.c.bf16 %v678_v19, %v674_v18  ;;  %v677_v30 = vld [vmem:[#allocation4 + $0x1b0] sm:$0xff]  ;;  %v680_v33 = vld [vmem:[#allocation4 + $0x1c8] sm:$0xff] }
  0x86   : > { %617 = vmatmul.mubr.f32.gmra.mrb[2].mxu1 %v466_v62  ;;  %751 = vmatprep.mubr.f32.mxu0 %v4173_v0  ;;  %v684_v34 = vld [vmem:[#allocation4 + $0x1e8] sm:$0xff]  ;;  %v682_v35 = vld [vmem:[#allocation4 + $0x1d8] sm:$0xff]  ;;  %v3699_v39 = vpack.c.bf16 %v675_v26, %v671_v25  ;;  %v3703_v40 = vpack.c.bf16 %v677_v30, %v673_v28  ;;  %v679_v42 = vld [vmem:[#allocation4 + $0x1c0] sm:$0xff] }
  0x87   : > { %2635 = vmatpush1.bf16.msra.mxu0 %v3628_v27  ;;  %822 = vmatprep.mubr.f32.mxu1 %v4173_v0  ;;  %v686_v38 = vld [vmem:[#allocation4 + $0x1f8] sm:$0xff]  ;;  %v3705_v41 = vpack.c.bf16 %v684_v34, %v680_v33  ;;  %v683_v43 = vld [vmem:[#allocation4 + $0x1e0] sm:$0xff]  ;;  %v681_v46 = vld [vmem:[#allocation4 + $0x1d0] sm:$0xff] }
  0x88   : > { %2667 = vmatpush1.bf16.msra.mxu1 %v3632_v31  ;;  %2637 = vmatprep.subr.bf16.mxu0 %v3634_v32  ;;  %v3708_v44 = vpack.c.bf16 %v686_v38, %v682_v35  ;;  %v685_v47 = vld [vmem:[#allocation4 + $0x1f0] sm:$0xff]  ;;  %v3711_v50 = vpack.c.bf16 %v683_v43, %v679_v42  ;;  %v332_v52 = vld [vmem:[%s3648_s7 + $0x2] sm:$0x3]  ;;  %v333_v58 = vld [vmem:[%s3648_s7 + $0x4] sm:$0x3] }
  0x89   : > { %2669 = vmatprep.subr.bf16.mxu1 %v3639_v37  ;;  %859 = vperm.xlu1 %3182, %v3682_v21   ;;  %v3715_v51 = vpack.c.bf16 %v685_v47, %v681_v46  ;;  %v1088_v56 = vadd.f32 %v332_v52, %v3682_v21  ;;  %v403_v9 = vld [vmem:[#allocation6] sm:$0xf] }
  0x8a   : > { %1061 = vperm.xlu0 %3181, %v332_v52   ;;  %v408_v18 = vrot.slane %v403_v9, %v407_v8  ;;  %v412_v19 = vrot.slane %v403_v9, %v411_v11  ;;  %v416_v21 = vrot.slane %v403_v9, %v415_v12  ;;  %v420_v26 = vrot.slane %v403_v9, %v419_v16 }
  0x8b   : > { %2639 = vmatpush1.bf16.msra.mxu0 %v3651_v45  ;;  %v3761_v59 = vadd.f32 %v1088_v56, %v333_v58 }
  0x8c   : > { %2671 = vmatpush1.bf16.msra.mxu1 %v3656_v48  ;;  %2641 = vmatprep.subr.bf16.mxu0 %v3658_v49 }
  0x8d   : > { %2673 = vmatprep.subr.bf16.mxu1 %v3665_v55 }
  0x8e   : > { %1279 = vperm.xlu0 %3181, %v333_v58  }
  0x8f   : > { %2643 = vmatpush1.bf16.msra.mxu0 %v3669_v63 }
  0x90   : > { %2675 = vmatpush1.bf16.msra.mxu1 %v3673_v4  ;;  %2645 = vmatprep.subr.bf16.mxu0 %v3675_v5 }
  0x91   : > { %2677 = vmatprep.subr.bf16.mxu1 %v3678_v10 }
  0x93   : > { %2647 = vmatpush1.bf16.msra.mxu0 %v3685_v22 }
  0x94   : > { %2679 = vmatpush1.bf16.msra.mxu1 %v3690_v23  ;;  %2649 = vmatprep.subr.bf16.mxu0 %v3692_v24 }
  0x95   : > { %2681 = vmatprep.subr.bf16.mxu1 %v3695_v29 }
  0x97   : > { %2651 = vmatpush1.bf16.msra.mxu0 %v3699_v39 }
  0x98   : > { %2683 = vmatpush1.bf16.msra.mxu1 %v3703_v40  ;;  %2653 = vmatprep.subr.bf16.mxu0 %v3705_v41 }
  0x99   : > { %2685 = vmatprep.subr.bf16.mxu1 %v3708_v44 }
  0x9b   : > { %2655 = vmatpush1.bf16.msra.mxu0 %v3711_v50 }
  0x9c   : > { %2687 = vmatpush1.bf16.msra.mxu1 %v3715_v51  ;;  %2689 = vmatprep.subr.bf16.mxu0 %v3599_v53 }
  0x9d   : > { %2721 = vmatprep.subr.bf16.mxu1 %v3601_v57 }
  0x9e   : > { %752 = vmatmul.mubr.f32.vlgmr.msra.gmra.mrb[4].mxu0 %v4173_v0 }
  0x9f   : > { %823 = vmatmul.mubr.f32.vlgmr.msra.gmra.mrb[4].mxu1 %v4173_v0  ;;  %2691 = vmatpush1.bf16.msra.mxu0 %v3603_v1 }
  0xa0   : > { %2723 = vmatpush1.bf16.msra.mxu1 %v3606_v2  ;;  %2693 = vmatprep.subr.bf16.mxu0 %v3608_v3 }
  0xa1   : > { %2725 = vmatprep.subr.bf16.mxu1 %v3611_v7  ;;  %938 = vmatprep.mubr.f32.mxu0 %v4173_v0 }
  0xa2   : > { %1009 = vmatprep.mubr.f32.mxu1 %v4173_v0 }
  0xa3   : > { %2695 = vmatpush1.bf16.msra.mxu0 %v3614_v13 }
  0xa4   : > { %2727 = vmatpush1.bf16.msra.mxu1 %v3618_v14  ;;  %2697 = vmatprep.subr.bf16.mxu0 %v3620_v15 }
  0xa5   : > { %2729 = vmatprep.subr.bf16.mxu1 %v3623_v20 }
  0xa7   : > { %2699 = vmatpush1.bf16.msra.mxu0 %v3628_v27 }
  0xa8   : > { %2731 = vmatpush1.bf16.msra.mxu1 %v3632_v31  ;;  %2701 = vmatprep.subr.bf16.mxu0 %v3634_v32 }
  0xa9   : > { %2733 = vmatprep.subr.bf16.mxu1 %v3639_v37 }
  0xab   : > { %2703 = vmatpush1.bf16.msra.mxu0 %v3651_v45 }
  0xac   : > { %2735 = vmatpush1.bf16.msra.mxu1 %v3656_v48  ;;  %2705 = vmatprep.subr.bf16.mxu0 %v3658_v49 }
  0xad   : > { %2737 = vmatprep.subr.bf16.mxu1 %v3665_v55 }
  0xaf   : > { %2707 = vmatpush1.bf16.msra.mxu0 %v3669_v63 }
  0xb0   : > { %2739 = vmatpush1.bf16.msra.mxu1 %v3673_v4  ;;  %2709 = vmatprep.subr.bf16.mxu0 %v3675_v5 }
  0xb1   : > { %2741 = vmatprep.subr.bf16.mxu1 %v3678_v10 }
  0xb3   : > { %2711 = vmatpush1.bf16.msra.mxu0 %v3685_v22 }
  0xb4   : > { %2743 = vmatpush1.bf16.msra.mxu1 %v3690_v23  ;;  %2713 = vmatprep.subr.bf16.mxu0 %v3692_v24 }
  0xb5   : > { %2745 = vmatprep.subr.bf16.mxu1 %v3695_v29 }
  0xb7   : > { %2715 = vmatpush1.bf16.msra.mxu0 %v3699_v39 }
  0xb8   : > { %2747 = vmatpush1.bf16.msra.mxu1 %v3703_v40  ;;  %2717 = vmatprep.subr.bf16.mxu0 %v3705_v41 }
  0xb9   : > { %2749 = vmatprep.subr.bf16.mxu1 %v3708_v44 }
  0xbb   : > { %2719 = vmatpush1.bf16.msra.mxu0 %v3711_v50 }
  0xbc   : > { %2751 = vmatpush1.bf16.msra.mxu1 %v3715_v51  ;;  %2753 = vmatprep.subr.bf16.mxu0 %v3599_v53 }
  0xbd   : > { %2785 = vmatprep.subr.bf16.mxu1 %v3601_v57 }
 0x151   : > { %v535_v60 = vpop.f32.mrb[0].mxu0 }
 0x152   : > { %v537_v61 = vpop.f32.mrb[1].mxu0  ;;  %v612_v62 = vpop.f32.mrb[0].mxu1  ;;  %v3775_v43 = vadd.f32 %v535_v60, %v408_v18 }
 0x153   : > { %v614_v6 = vpop.f32.mrb[1].mxu1  ;;  %v3777_v46 = vadd.f32 %v537_v61, %v412_v19  ;;  %v3784_v60 = vadd.f32 %v612_v62, %v416_v21 }
 0x154   : > { %v3781_v16 = vadd.f32 %v614_v6, %v420_v26 }
 0x158   : > { %v541_v25 = vpop.f32.mrb[2].mxu0 }
 0x159   : > { %v3767_v28 = vadd.f32 %v541_v25, %v408_v18  ;;  %v543_v30 = vpop.f32.mrb[3].mxu0  ;;  %v618_v33 = vpop.f32.mrb[2].mxu1 }
 0x15a   : > { %v3769_v34 = vadd.f32 %v543_v30, %v412_v19  ;;  %v3771_v35 = vadd.f32 %v618_v33, %v416_v21  ;;  %v620_v38 = vpop.f32.mrb[3].mxu1 }
 0x15b   : > { %v3773_v42 = vadd.f32 %v620_v38, %v420_v26 }
 0x15c   : > { %4188 = vst [vmem:[#allocation9_spill] sm:$0xff] %v3771_v35 }
 0x171   : > { %v753_v47 = vpop.f32.mrb[4].mxu0 }
 0x172   : > { %v829_v52 = vadd.f32 %v753_v47, %v3775_v43  ;;  %v824_v56 = vpop.f32.mrb[4].mxu1  ;;  %v755_v58 = vpop.f32.mrb[5].mxu0 }
 0x173   : > { %v830_v8 = vadd.f32 %v755_v58, %v3777_v46  ;;  %v826_v9 = vpop.f32.mrb[5].mxu1  ;;  %v831_v18 = vadd.f32 %v824_v56, %v3784_v60 }
 0x174   : > { %v2532_v11 = vmul.f32 -1.442695, %v829_v52  ;;  %v832_v25 = vadd.f32 %v826_v9, %v3781_v16 }
 0x175   : > { %v2533_v12 = vmul.f32 -1.442695, %v830_v8 }
 0x176   : > { %3183 = vpow2.f32 %v2532_v11  ;;  %v2534_v61 = vmul.f32 -1.442695, %v832_v25 }
 0x177   : > { %3185 = vpow2.f32 %v2533_v12 }
 0x178   : > { %3187 = vpow2.f32 %v2534_v61 }
 0x179   : > { %3189 = vtanh.f32 %v831_v18 }
 0x180   : > { %v3184_v19 = vpop.eup %3183 }
 0x181   : > { %v3186_v30 = vpop.eup %3185  ;;  %v836_v33 = vadd.f32 1.0, %v3184_v19 }
 0x182   : > { %v842_v38 = vadd.f32 1.0, %v3186_v30  ;;  %v3188_v47 = vpop.eup %3187 }
 0x183   : > { %3191 = vrcp.f32 %v836_v33  ;;  %v3190_v52 = vpop.eup %3189  ;;  %v849_v8 = vadd.f32 1.0, %v3188_v47 }
 0x184   : > { %3193 = vrcp.f32 %v842_v38 }
 0x185   : > { %3195 = vrcp.f32 %v849_v8 }
 0x18d   : > { %v3192_v6 = vpop.eup %3191 }
 0x18e   : > { %v3194_v26 = vpop.eup %3193  ;;  %v853_v58 = vmul.f32 %v3192_v6, %v3190_v52 }
 0x18f   : > { %v852_v9 = vmul.f32 0.0, %v3194_v26  ;;  %v3196_v21 = vpop.eup %3195 }
 0x191   : > { %v3787_v62 = vadd.f32 %v853_v58, %v852_v9 }
 0x193   : > { %3197 = vtanh.f32 %v3787_v62 }
 0x19d   : > { %v3198_v56 = vpop.eup %3197 }
 0x19e   : > { %v3790_v11 = vmul.f32 %v3198_v56, %v3196_v21 }
 0x1a0   : > { %939 = vmatmul.mubr.f32.vlgmr.msra.gmra.mrb[6].mxu0 %v3790_v11  ;;  %1010 = vmatmul.mubr.f32.vlgmr.msra.gmra.mrb[6].mxu1 %v3790_v11 }
 0x1a1   : > { %2755 = vmatpush1.bf16.msra.mxu0 %v3603_v1  ;;  %2787 = vmatpush1.bf16.msra.mxu1 %v3606_v2 }
 0x1a2   : > { %2757 = vmatprep.subr.bf16.mxu0 %v3608_v3  ;;  %2789 = vmatprep.subr.bf16.mxu1 %v3611_v7 }
 0x1a3   : > { %1156 = vmatprep.mubr.f32.mxu0 %v4173_v0  ;;  %1227 = vmatprep.mubr.f32.mxu1 %v4173_v0 }
 0x1a5   : > { %2759 = vmatpush1.bf16.msra.mxu0 %v3614_v13  ;;  %2791 = vmatpush1.bf16.msra.mxu1 %v3618_v14 }
 0x1a6   : > { %2761 = vmatprep.subr.bf16.mxu0 %v3620_v15  ;;  %2793 = vmatprep.subr.bf16.mxu1 %v3623_v20 }
 0x1a9   : > { %2763 = vmatpush1.bf16.msra.mxu0 %v3628_v27  ;;  %2795 = vmatpush1.bf16.msra.mxu1 %v3632_v31 }
 0x1aa   : > { %2765 = vmatprep.subr.bf16.mxu0 %v3634_v32  ;;  %2797 = vmatprep.subr.bf16.mxu1 %v3639_v37 }
 0x1ad   : > { %2767 = vmatpush1.bf16.msra.mxu0 %v3651_v45  ;;  %2799 = vmatpush1.bf16.msra.mxu1 %v3656_v48 }
 0x1ae   : > { %2769 = vmatprep.subr.bf16.mxu0 %v3658_v49  ;;  %2801 = vmatprep.subr.bf16.mxu1 %v3665_v55 }
 0x1b1   : > { %2771 = vmatpush1.bf16.msra.mxu0 %v3669_v63  ;;  %2803 = vmatpush1.bf16.msra.mxu1 %v3673_v4 }
 0x1b2   : > { %2773 = vmatprep.subr.bf16.mxu0 %v3675_v5  ;;  %2805 = vmatprep.subr.bf16.mxu1 %v3678_v10 }
 0x1b5   : > { %2775 = vmatpush1.bf16.msra.mxu0 %v3685_v22  ;;  %2807 = vmatpush1.bf16.msra.mxu1 %v3690_v23 }
 0x1b6   : > { %2777 = vmatprep.subr.bf16.mxu0 %v3692_v24  ;;  %2809 = vmatprep.subr.bf16.mxu1 %v3695_v29 }
 0x1b9   : > { %2779 = vmatpush1.bf16.msra.mxu0 %v3699_v39  ;;  %2811 = vmatpush1.bf16.msra.mxu1 %v3703_v40 }
 0x1ba   : > { %2781 = vmatprep.subr.bf16.mxu0 %v3705_v41  ;;  %2813 = vmatprep.subr.bf16.mxu1 %v3708_v44 }
 0x1bd   : > { %2783 = vmatpush1.bf16.msra.mxu0 %v3711_v50  ;;  %2815 = vmatpush1.bf16.msra.mxu1 %v3715_v51 }
 0x1be   : > { %2817 = vmatprep.subr.bf16.mxu0 %v3599_v53  ;;  %2849 = vmatprep.subr.bf16.mxu1 %v3601_v57 }
 0x273   : > { %v940_v12 = vpop.f32.mrb[6].mxu0  ;;  %v1011_v25 = vpop.f32.mrb[6].mxu1 }
 0x274   : > { %v1020_v61 = vrot.slane %v940_v12, 6  ;;  %v942_v18 = vpop.f32.mrb[7].mxu0  ;;  %v1013_v19 = vpop.f32.mrb[7].mxu1  ;;  %v1022_v58 = vrot.slane %v1011_v25, 6 }
 0x275   : > { %v1021_v30 = vrot.slane %v942_v18, 6  ;;  %v1023_v6 = vrot.slane %v1013_v19, 6 }
 0x276   : > { %v1028_v33 = vadd.f32 %v1020_v61, %v3775_v43  ;;  %v1030_v9 = vadd.f32 %v1022_v58, %v3784_v60  ;;  %v3429_v61 = vmov 269488144  }
 0x277   : > { %v1029_v38 = vadd.f32 %v1021_v30, %v3777_v46  ;;  %v1031_v26 = vadd.f32 %v1023_v6, %v3781_v16  ;;  %v863_v30 = vunpack.c.l.s4 %v3429_v61 }
 0x278   : > { %v2535_v47 = vmul.f32 -1.442695, %v1028_v33 }
 0x279   : > { %v2536_v52 = vmul.f32 -1.442695, %v1029_v38  ;;  %v2537_v8 = vmul.f32 -1.442695, %v1031_v26  ;;  %v864_v25 = vunpack.c.0.s8 %v863_v30 }
 0x27a   : > { %3199 = vpow2.f32 %v2535_v47  ;;  %v1052_v47 = vrot.slane %v3787_v62, 6 }
 0x27b   : > { %3201 = vpow2.f32 %v2536_v52 }
 0x27c   : > { %3203 = vpow2.f32 %v2537_v8  ;;  %v3836_v8 = vsub.s32 %v864_v25, %v3588_v17 }
 0x27d   : > { %3205 = vtanh.f32 %v1030_v9 }
 0x284   : > { %v3200_v21 = vpop.eup %3199 }
 0x285   : > { %v3202_v56 = vpop.eup %3201  ;;  %v1035_v12 = vadd.f32 1.0, %v3200_v21  ;;  %v1062_v21 = vpop.permute.xlu0 %1061 }
 0x286   : > { %v1041_v18 = vadd.f32 1.0, %v3202_v56  ;;  %v3204_v33 = vpop.eup %3203  ;;  %v3840_v9 = vrot.slane %v1062_v21, %v3836_v8  ;;  %v3842_v56 = vpop.permute.xlu1 %1497 }
 0x287   : > { %3207 = vrcp.f32 %v1035_v12  ;;  %v3206_v19 = vpop.eup %3205  ;;  %v1048_v26 = vadd.f32 1.0, %v3204_v33 }
 0x288   : > { %3209 = vrcp.f32 %v1041_v18  ;;  %4189 = vst [vmem:[#allocation10_spill] sm:$0xff] %v3840_v9  ;;  %v1072_v62 = vcombine.low %v3840_v9, %v3840_v9 }
 0x289   : > { %3211 = vrcp.f32 %v1048_v26 }
 0x28a   : > { %v860_v12 = vpop.permute.xlu1 %859  ;;  %v1079_v61 = vrot.slane %v1072_v62, %v3595_v36 }
 0x28b   : > { %v3848_v33 = vrot.slane %v860_v12, %v3836_v8 }
 0x28d   : > { %4190 = vst [vmem:[#allocation11_spill] sm:$0xff] %v3848_v33 }
 0x291   : > { %v3208_v38 = vpop.eup %3207 }
 0x292   : > { %v3210_v52 = vpop.eup %3209  ;;  %v1055_v6 = vmul.f32 %v3208_v38, %v3206_v19 }
 0x293   : > { %v1054_v58 = vmul.f32 %v3210_v52, %v1052_v47  ;;  %v3212_v18 = vpop.eup %3211  ;;  %v869_v47 = vmul.f32 %v3848_v33, %v3790_v11 }
 0x295   : > { %v3833_v0 = vadd.f32 %v1055_v6, %v1054_v58  ;;  %v4191_v6 = vmov 0.0  }
 0x297   : > { %3213 = vtanh.f32 %v3833_v0 }
 0x2a1   : > { %v3214_v30 = vpop.eup %3213 }
 0x2a2   : > { %v1058_v17 = vmul.f32 %v3214_v30, %v3212_v18 }
 0x2a4   : > { %v1081_v19 = vmul.f32 %v1079_v61, %v1058_v17  ;;  %v1090_v38 = vrot.slane %v1058_v17, 2 }
 0x2a6   : > { %v1083_v52 = vrot.slane %v1081_v19, 2  ;;  %1157 = vmatmul.mubr.f32.vlgmr.msra.gmra.mrb[8].mxu0 %v1090_v38  ;;  %1228 = vmatmul.mubr.f32.vlgmr.msra.gmra.mrb[8].mxu1 %v1090_v38 }
 0x2a7   : > { %2819 = vmatpush1.bf16.msra.mxu0 %v3603_v1  ;;  %2851 = vmatpush1.bf16.msra.mxu1 %v3606_v2 }
 0x2a8   : > { %v3854_v25 = vadd.f32 %v1083_v52, %v869_v47  ;;  %2821 = vmatprep.subr.bf16.mxu0 %v3608_v3  ;;  %2853 = vmatprep.subr.bf16.mxu1 %v3611_v7 }
 0x2a9   : > { %1374 = vmatprep.mubr.f32.mxu0 %v4191_v6  ;;  %1445 = vmatprep.mubr.f32.mxu1 %v4191_v6 }
 0x2ab   : > { %2823 = vmatpush1.bf16.msra.mxu0 %v3614_v13  ;;  %2855 = vmatpush1.bf16.msra.mxu1 %v3618_v14 }
 0x2ac   : > { %2825 = vmatprep.subr.bf16.mxu0 %v3620_v15  ;;  %2857 = vmatprep.subr.bf16.mxu1 %v3623_v20 }
 0x2af   : > { %2827 = vmatpush1.bf16.msra.mxu0 %v3628_v27  ;;  %2859 = vmatpush1.bf16.msra.mxu1 %v3632_v31 }
 0x2b0   : > { %2829 = vmatprep.subr.bf16.mxu0 %v3634_v32  ;;  %2861 = vmatprep.subr.bf16.mxu1 %v3639_v37 }
 0x2b3   : > { %2831 = vmatpush1.bf16.msra.mxu0 %v3651_v45  ;;  %2863 = vmatpush1.bf16.msra.mxu1 %v3656_v48 }
 0x2b4   : > { %2833 = vmatprep.subr.bf16.mxu0 %v3658_v49  ;;  %2865 = vmatprep.subr.bf16.mxu1 %v3665_v55 }
 0x2b7   : > { %2835 = vmatpush1.bf16.msra.mxu0 %v3669_v63  ;;  %2867 = vmatpush1.bf16.msra.mxu1 %v3673_v4 }
 0x2b8   : > { %2837 = vmatprep.subr.bf16.mxu0 %v3675_v5  ;;  %2869 = vmatprep.subr.bf16.mxu1 %v3678_v10 }
 0x2bb   : > { %2839 = vmatpush1.bf16.msra.mxu0 %v3685_v22  ;;  %2871 = vmatpush1.bf16.msra.mxu1 %v3690_v23 }
 0x2bc   : > { %2841 = vmatprep.subr.bf16.mxu0 %v3692_v24  ;;  %2873 = vmatprep.subr.bf16.mxu1 %v3695_v29 }
 0x2bf   : > { %2843 = vmatpush1.bf16.msra.mxu0 %v3699_v39  ;;  %2875 = vmatpush1.bf16.msra.mxu1 %v3703_v40 }
 0x2c0   : > { %2845 = vmatprep.subr.bf16.mxu0 %v3705_v41  ;;  %2877 = vmatprep.subr.bf16.mxu1 %v3708_v44 }
 0x2c3   : > { %2847 = vmatpush1.bf16.msra.mxu0 %v3711_v50  ;;  %2879 = vmatpush1.bf16.msra.mxu1 %v3715_v51 }
 0x2c4   : > { %2881 = vmatprep.subr.bf16.mxu0 %v3599_v53  ;;  %2913 = vmatprep.subr.bf16.mxu1 %v3601_v57 }
 0x379   : > { %v1158_v11 = vpop.f32.mrb[8].mxu0  ;;  %v1229_v26 = vpop.f32.mrb[8].mxu1 }
 0x37a   : > { %v1238_v58 = vrot.slane %v1158_v11, 4  ;;  %v1160_v21 = vpop.f32.mrb[9].mxu0  ;;  %v1231_v62 = vpop.f32.mrb[9].mxu1  ;;  %v1240_v47 = vrot.slane %v1229_v26, 4 }
 0x37b   : > { %v1239_v12 = vrot.slane %v1160_v21, 4  ;;  %v1241_v19 = vrot.slane %v1231_v62, 4  ;;  %v1270_v62 = vrot.slane %v3833_v0, 6 }
 0x37c   : > { %v1246_v18 = vadd.f32 %v1238_v58, %v3775_v43  ;;  %v1248_v9 = vadd.f32 %v1240_v47, %v3784_v60 }
 0x37d   : > { %v1247_v61 = vadd.f32 %v1239_v12, %v3777_v46  ;;  %v1249_v38 = vadd.f32 %v1241_v19, %v3781_v16 }
 0x37e   : > { %v2538_v30 = vmul.f32 -1.442695, %v1246_v18 }
 0x37f   : > { %v2539_v17 = vmul.f32 -1.442695, %v1247_v61  ;;  %v2540_v52 = vmul.f32 -1.442695, %v1249_v38  ;;  %v1280_v38 = vpop.permute.xlu0 %1279 }
 0x380   : > { %3215 = vpow2.f32 %v2538_v30 }
 0x381   : > { %3217 = vpow2.f32 %v2539_v17 }
 0x382   : > { %3219 = vpow2.f32 %v2540_v52 }
 0x383   : > { %3221 = vtanh.f32 %v1248_v9  ;;  %v3897_v9 = vrot.slane %v1280_v38, %v3836_v8 }
 0x385   : > { %4192 = vst [vmem:[#allocation12_spill] sm:$0xff] %v3897_v9 }
 0x38a   : > { %v3216_v33 = vpop.eup %3215 }
 0x38b   : > { %v3218_v11 = vpop.eup %3217  ;;  %v1253_v35 = vadd.f32 1.0, %v3216_v33 }
 0x38c   : > { %v1259_v21 = vadd.f32 1.0, %v3218_v11  ;;  %v3220_v58 = vpop.eup %3219 }
 0x38d   : > { %3223 = vrcp.f32 %v1253_v35  ;;  %v3222_v12 = vpop.eup %3221  ;;  %v1266_v17 = vadd.f32 1.0, %v3220_v58  ;;  %v1296_v35 = vrot.slane %v3897_v9, %v3595_v36 }
 0x38e   : > { %3225 = vrcp.f32 %v1259_v21 }
 0x38f   : > { %3227 = vrcp.f32 %v1266_v17  ;;  %v1297_v47 = vcombine.low %v1296_v35, %v1296_v35 }
 0x397   : > { %v3224_v18 = vpop.eup %3223 }
 0x398   : > { %v3226_v61 = vpop.eup %3225  ;;  %v1273_v30 = vmul.f32 %v3224_v18, %v3222_v12  ;;  %v3941_v18 = vld [vmem:[%s3648_s7 + $0xa] sm:$0x3] }
 0x399   : > { %v1272_v26 = vmul.f32 %v3226_v61, %v1270_v62  ;;  %v3228_v33 = vpop.eup %3227  ;;  %v335_v62 = vld [vmem:[%s3648_s7 + $0x8] sm:$0x3]  ;;  %1906 = vperm.xlu0 %3181, %v3941_v18  }
 0x39b   : > { %v3893_v19 = vadd.f32 %v1273_v30, %v1272_v26  ;;  %v3948_v30 = vld [vmem:[%s3648_s7 + $0xe] sm:$0x3] }
 0x39c   : > { %4193 = vst [vmem:[#allocation13_spill] sm:$0xff] %v3948_v30 }
 0x39d   : > { %3229 = vtanh.f32 %v3893_v19  ;;  %2342 = vperm.xlu0 %3181, %v3948_v30  }
 0x3a1   : > { %1704 = vperm.xlu0 %3181, %v335_v62  }
 0x3a7   : > { %v3230_v52 = vpop.eup %3229 }
 0x3a8   : > { %v1276_v0 = vmul.f32 %v3230_v52, %v3228_v33 }
 0x3aa   : > { %v1299_v11 = vmul.f32 %v1297_v47, %v1276_v0  ;;  %v1308_v21 = vrot.slane %v1276_v0, 4 }
 0x3ac   : > { %v1301_v58 = vrot.slane %v1299_v11, 4  ;;  %1375 = vmatmul.mubr.f32.vlgmr.msra.gmra.mrb[10].mxu0 %v1308_v21  ;;  %1446 = vmatmul.mubr.f32.vlgmr.msra.gmra.mrb[10].mxu1 %v1308_v21 }
 0x3ad   : > { %2883 = vmatpush1.bf16.msra.mxu0 %v3603_v1  ;;  %2915 = vmatpush1.bf16.msra.mxu1 %v3606_v2 }
 0x3ae   : > { %v3904_v12 = vadd.f32 %v1301_v58, %v3854_v25  ;;  %2885 = vmatprep.subr.bf16.mxu0 %v3608_v3  ;;  %2917 = vmatprep.subr.bf16.mxu1 %v3611_v7  ;;  %v1525_v25 = vadd.f32 %v3761_v59, %v3662_v54 }
 0x3af   : > { %1593 = vmatprep.mubr.f32.mxu0 %v4191_v6  ;;  %1664 = vmatprep.mubr.f32.mxu1 %v4191_v6 }
 0x3b0   : > { %v3945_v61 = vadd.f32 %v1525_v25, %v335_v62 }
 0x3b1   : > { %2887 = vmatpush1.bf16.msra.mxu0 %v3614_v13  ;;  %2919 = vmatpush1.bf16.msra.mxu1 %v3618_v14 }
 0x3b2   : > { %2889 = vmatprep.subr.bf16.mxu0 %v3620_v15  ;;  %2921 = vmatprep.subr.bf16.mxu1 %v3623_v20 }
 0x3b5   : > { %2891 = vmatpush1.bf16.msra.mxu0 %v3628_v27  ;;  %2923 = vmatpush1.bf16.msra.mxu1 %v3632_v31 }
 0x3b6   : > { %2893 = vmatprep.subr.bf16.mxu0 %v3634_v32  ;;  %2925 = vmatprep.subr.bf16.mxu1 %v3639_v37 }
 0x3b9   : > { %2895 = vmatpush1.bf16.msra.mxu0 %v3651_v45  ;;  %2927 = vmatpush1.bf16.msra.mxu1 %v3656_v48 }
 0x3ba   : > { %2897 = vmatprep.subr.bf16.mxu0 %v3658_v49  ;;  %2929 = vmatprep.subr.bf16.mxu1 %v3665_v55 }
 0x3bd   : > { %2899 = vmatpush1.bf16.msra.mxu0 %v3669_v63  ;;  %2931 = vmatpush1.bf16.msra.mxu1 %v3673_v4 }
 0x3be   : > { %2901 = vmatprep.subr.bf16.mxu0 %v3675_v5  ;;  %2933 = vmatprep.subr.bf16.mxu1 %v3678_v10 }
 0x3c1   : > { %2903 = vmatpush1.bf16.msra.mxu0 %v3685_v22  ;;  %2935 = vmatpush1.bf16.msra.mxu1 %v3690_v23 }
 0x3c2   : > { %2905 = vmatprep.subr.bf16.mxu0 %v3692_v24  ;;  %2937 = vmatprep.subr.bf16.mxu1 %v3695_v29 }
 0x3c5   : > { %2907 = vmatpush1.bf16.msra.mxu0 %v3699_v39  ;;  %2939 = vmatpush1.bf16.msra.mxu1 %v3703_v40 }
 0x3c6   : > { %2909 = vmatprep.subr.bf16.mxu0 %v3705_v41  ;;  %2941 = vmatprep.subr.bf16.mxu1 %v3708_v44 }
 0x3c9   : > { %2911 = vmatpush1.bf16.msra.mxu0 %v3711_v50  ;;  %2943 = vmatpush1.bf16.msra.mxu1 %v3715_v51 }
 0x3ca   : > { %2945 = vmatprep.subr.bf16.mxu0 %v3599_v53  ;;  %2977 = vmatprep.subr.bf16.mxu1 %v3601_v57 }
 0x47f   : > { %v1376_v17 = vpop.f32.mrb[10].mxu0  ;;  %v1447_v26 = vpop.f32.mrb[10].mxu1 }
 0x480   : > { %v1456_v38 = vrot.slane %v1376_v17, 2  ;;  %v1378_v35 = vpop.f32.mrb[11].mxu0  ;;  %v1449_v33 = vpop.f32.mrb[11].mxu1  ;;  %v1458_v58 = vrot.slane %v1447_v26, 2 }
 0x481   : > { %v1457_v47 = vrot.slane %v1378_v35, 2  ;;  %v1459_v11 = vrot.slane %v1449_v33, 2  ;;  %v1488_v33 = vrot.slane %v3893_v19, 6 }
 0x482   : > { %v1464_v54 = vadd.f32 %v1456_v38, %v3775_v43  ;;  %v1466_v62 = vadd.f32 %v1458_v58, %v3784_v60  ;;  %v3958_v60 = vrot.slane %v3842_v56, %v3836_v8 }
 0x483   : > { %v1465_v59 = vadd.f32 %v1457_v47, %v3777_v46  ;;  %v1467_v21 = vadd.f32 %v1459_v11, %v3781_v16 }
 0x484   : > { %v2541_v52 = vmul.f32 -1.442695, %v1464_v54 }
 0x485   : > { %v2542_v0 = vmul.f32 -1.442695, %v1465_v59  ;;  %v2543_v25 = vmul.f32 -1.442695, %v1467_v21 }
 0x486   : > { %3231 = vpow2.f32 %v2541_v52 }
 0x487   : > { %3233 = vpow2.f32 %v2542_v0 }
 0x488   : > { %3235 = vpow2.f32 %v2543_v25 }
 0x489   : > { %3237 = vtanh.f32 %v1466_v62 }
 0x490   : > { %v3232_v9 = vpop.eup %3231 }
 0x491   : > { %v3234_v17 = vpop.eup %3233  ;;  %v1471_v30 = vadd.f32 1.0, %v3232_v9  ;;  %v1508_v9 = vcombine.low %v3958_v60, %v3958_v60 }
 0x492   : > { %v1477_v35 = vadd.f32 1.0, %v3234_v17  ;;  %v3236_v43 = vpop.eup %3235 }
 0x493   : > { %3239 = vrcp.f32 %v1471_v30  ;;  %v3238_v46 = vpop.eup %3237  ;;  %v1484_v16 = vadd.f32 1.0, %v3236_v43  ;;  %v1515_v30 = vrot.slane %v1508_v9, %v3595_v36 }
 0x494   : > { %3241 = vrcp.f32 %v1477_v35 }
 0x495   : > { %3243 = vrcp.f32 %v1484_v16  ;;  %v1516_v19 = vcombine.low %v1515_v30, %v1515_v30  ;;  %v4194_v16 = vld [vmem:[#allocation9_spill] sm:$0xff] }
 0x49d   : > { %v3240_v38 = vpop.eup %3239 }
 0x49e   : > { %v3242_v47 = vpop.eup %3241  ;;  %v1491_v54 = vmul.f32 %v3240_v38, %v3238_v46 }
 0x49f   : > { %v1490_v26 = vmul.f32 %v3242_v47, %v1488_v33  ;;  %v3244_v52 = vpop.eup %3243 }
 0x4a1   : > { %v3960_v59 = vadd.f32 %v1491_v54, %v1490_v26 }
 0x4a3   : > { %3245 = vtanh.f32 %v3960_v59 }
 0x4ad   : > { %v3246_v0 = vpop.eup %3245 }
 0x4ae   : > { %v1494_v11 = vmul.f32 %v3246_v0, %v3244_v52 }
 0x4b0   : > { %v1527_v21 = vrot.slane %v1494_v11, 6  ;;  %v1518_v58 = vmul.f32 %v1516_v19, %v1494_v11 }
 0x4b2   : > { %1594 = vmatmul.mubr.f32.vlgmr.msra.gmra.mrb[12].mxu0 %v1527_v21  ;;  %1665 = vmatmul.mubr.f32.vlgmr.msra.gmra.mrb[12].mxu1 %v1527_v21  ;;  %v1520_v56 = vrot.slane %v1518_v58, 6  ;;  %v1695_v58 = vrot.slane %v3960_v59, 6 }
 0x4b3   : > { %2947 = vmatpush1.bf16.msra.mxu0 %v3603_v1  ;;  %2979 = vmatpush1.bf16.msra.mxu1 %v3606_v2 }
 0x4b4   : > { %2949 = vmatprep.subr.bf16.mxu0 %v3608_v3  ;;  %2981 = vmatprep.subr.bf16.mxu1 %v3611_v7  ;;  %v3971_v25 = vadd.f32 %v1520_v56, %v3904_v12  ;;  %v4008_v56 = vpop.permute.xlu0 %1906 }
 0x4b5   : > { %1783 = vmatprep.mubr.f32.mxu0 %v4191_v6  ;;  %1854 = vmatprep.mubr.f32.mxu1 %v4191_v6 }
 0x4b7   : > { %2951 = vmatpush1.bf16.msra.mxu0 %v3614_v13  ;;  %2983 = vmatpush1.bf16.msra.mxu1 %v3618_v14 }
 0x4b8   : > { %2953 = vmatprep.subr.bf16.mxu0 %v3620_v15  ;;  %2985 = vmatprep.subr.bf16.mxu1 %v3623_v20 }
 0x4bb   : > { %2955 = vmatpush1.bf16.msra.mxu0 %v3628_v27  ;;  %2987 = vmatpush1.bf16.msra.mxu1 %v3632_v31 }
 0x4bc   : > { %2957 = vmatprep.subr.bf16.mxu0 %v3634_v32  ;;  %2989 = vmatprep.subr.bf16.mxu1 %v3639_v37 }
 0x4bf   : > { %2959 = vmatpush1.bf16.msra.mxu0 %v3651_v45  ;;  %2991 = vmatpush1.bf16.msra.mxu1 %v3656_v48 }
 0x4c0   : > { %2961 = vmatprep.subr.bf16.mxu0 %v3658_v49  ;;  %2993 = vmatprep.subr.bf16.mxu1 %v3665_v55 }
 0x4c3   : > { %2963 = vmatpush1.bf16.msra.mxu0 %v3669_v63  ;;  %2995 = vmatpush1.bf16.msra.mxu1 %v3673_v4 }
 0x4c4   : > { %2965 = vmatprep.subr.bf16.mxu0 %v3675_v5  ;;  %2997 = vmatprep.subr.bf16.mxu1 %v3678_v10 }
 0x4c7   : > { %2967 = vmatpush1.bf16.msra.mxu0 %v3685_v22  ;;  %2999 = vmatpush1.bf16.msra.mxu1 %v3690_v23 }
 0x4c8   : > { %2969 = vmatprep.subr.bf16.mxu0 %v3692_v24  ;;  %3001 = vmatprep.subr.bf16.mxu1 %v3695_v29 }
 0x4cb   : > { %2971 = vmatpush1.bf16.msra.mxu0 %v3699_v39  ;;  %3003 = vmatpush1.bf16.msra.mxu1 %v3703_v40 }
 0x4cc   : > { %2973 = vmatprep.subr.bf16.mxu0 %v3705_v41  ;;  %3005 = vmatprep.subr.bf16.mxu1 %v3708_v44 }
 0x4cf   : > { %2975 = vmatpush1.bf16.msra.mxu0 %v3711_v50  ;;  %3007 = vmatpush1.bf16.msra.mxu1 %v3715_v51 }
 0x4d0   : > { %3009 = vmatprep.subr.bf16.mxu0 %v3599_v53  ;;  %3041 = vmatprep.subr.bf16.mxu1 %v3601_v57 }
 0x585   : > { %v1595_v12 = vpop.f32.mrb[12].mxu0  ;;  %v1666_v62 = vpop.f32.mrb[12].mxu1 }
 0x586   : > { %v1671_v17 = vadd.f32 %v1595_v12, %v3767_v28  ;;  %v1597_v35 = vpop.f32.mrb[13].mxu0  ;;  %v1668_v43 = vpop.f32.mrb[13].mxu1  ;;  %v1673_v26 = vadd.f32 %v1666_v62, %v4194_v16 }
 0x587   : > { %v1672_v46 = vadd.f32 %v1597_v35, %v3769_v34  ;;  %v1674_v47 = vadd.f32 %v1668_v43, %v3773_v42 }
 0x588   : > { %v2544_v38 = vmul.f32 -1.442695, %v1671_v17 }
 0x589   : > { %v2545_v33 = vmul.f32 -1.442695, %v1672_v46  ;;  %v2546_v54 = vmul.f32 -1.442695, %v1674_v47  ;;  %v4012_v46 = vpop.permute.xlu0 %2342 }
 0x58a   : > { %3247 = vpow2.f32 %v2544_v38 }
 0x58b   : > { %3249 = vpow2.f32 %v2545_v33 }
 0x58c   : > { %3251 = vpow2.f32 %v2546_v54 }
 0x58d   : > { %3253 = vtanh.f32 %v1673_v26  ;;  %v1705_v38 = vpop.permute.xlu0 %1704 }
 0x58e   : > { %v4016_v47 = vrot.slane %v1705_v38, %v3836_v8 }
 0x594   : > { %v3248_v9 = vpop.eup %3247 }
 0x595   : > { %v3250_v30 = vpop.eup %3249  ;;  %v1678_v52 = vadd.f32 1.0, %v3248_v9 }
 0x596   : > { %v1684_v19 = vadd.f32 1.0, %v3250_v30  ;;  %v3252_v0 = vpop.eup %3251  ;;  %v1933_v30 = vadd.f32 %v3945_v61, %v3941_v18 }
 0x597   : > { %3255 = vrcp.f32 %v1678_v52  ;;  %v3254_v11 = vpop.eup %3253  ;;  %v1691_v35 = vadd.f32 1.0, %v3252_v0 }
 0x598   : > { %3257 = vrcp.f32 %v1684_v19 }
 0x599   : > { %3259 = vrcp.f32 %v1691_v35 }
 0x5a1   : > { %v3256_v21 = vpop.eup %3255 }
 0x5a2   : > { %v3258_v12 = vpop.eup %3257  ;;  %v1698_v17 = vmul.f32 %v3256_v21, %v3254_v11 }
 0x5a3   : > { %v1697_v43 = vmul.f32 %v3258_v12, %v1695_v58  ;;  %v3260_v33 = vpop.eup %3259 }
 0x5a5   : > { %v4010_v62 = vadd.f32 %v1698_v17, %v1697_v43 }
 0x5a7   : > { %3261 = vtanh.f32 %v4010_v62 }
 0x5b1   : > { %v3262_v54 = vpop.eup %3261 }
 0x5b2   : > { %v1701_v59 = vmul.f32 %v3262_v54, %v3260_v33 }
 0x5b4   : > { %v1714_v26 = vmul.f32 %v4016_v47, %v1701_v59  ;;  %1784 = vmatmul.mubr.f32.vlgmr.msra.gmra.mrb[14].mxu0 %v1701_v59  ;;  %1855 = vmatmul.mubr.f32.vlgmr.msra.gmra.mrb[14].mxu1 %v1701_v59 }
 0x5b5   : > { %3011 = vmatpush1.bf16.msra.mxu0 %v3603_v1  ;;  %3043 = vmatpush1.bf16.msra.mxu1 %v3606_v2 }
 0x5b6   : > { %v4022_v9 = vadd.f32 %v1714_v26, %v3971_v25  ;;  %3013 = vmatprep.subr.bf16.mxu0 %v3608_v3  ;;  %3045 = vmatprep.subr.bf16.mxu1 %v3611_v7  ;;  %v337_v25 = vld [vmem:[%s3648_s7 + $0xc] sm:$0x3] }
 0x5b7   : > { %2001 = vmatprep.mubr.f32.mxu0 %v4191_v6  ;;  %2072 = vmatprep.mubr.f32.mxu1 %v4191_v6  ;;  %v4059_v52 = vadd.f32 %v1933_v30, %v337_v25 }
 0x5b8   : > { %2124 = vperm.xlu1 %3182, %v337_v25  }
 0x5b9   : > { %3015 = vmatpush1.bf16.msra.mxu0 %v3614_v13  ;;  %3047 = vmatpush1.bf16.msra.mxu1 %v3618_v14 }
 0x5ba   : > { %3017 = vmatprep.subr.bf16.mxu0 %v3620_v15  ;;  %3049 = vmatprep.subr.bf16.mxu1 %v3623_v20 }
 0x5bd   : > { %3019 = vmatpush1.bf16.msra.mxu0 %v3628_v27  ;;  %3051 = vmatpush1.bf16.msra.mxu1 %v3632_v31 }
 0x5be   : > { %3021 = vmatprep.subr.bf16.mxu0 %v3634_v32  ;;  %3053 = vmatprep.subr.bf16.mxu1 %v3639_v37 }
 0x5c1   : > { %3023 = vmatpush1.bf16.msra.mxu0 %v3651_v45  ;;  %3055 = vmatpush1.bf16.msra.mxu1 %v3656_v48 }
 0x5c2   : > { %3025 = vmatprep.subr.bf16.mxu0 %v3658_v49  ;;  %3057 = vmatprep.subr.bf16.mxu1 %v3665_v55 }
 0x5c5   : > { %3027 = vmatpush1.bf16.msra.mxu0 %v3669_v63  ;;  %3059 = vmatpush1.bf16.msra.mxu1 %v3673_v4 }
 0x5c6   : > { %3029 = vmatprep.subr.bf16.mxu0 %v3675_v5  ;;  %3061 = vmatprep.subr.bf16.mxu1 %v3678_v10 }
 0x5c9   : > { %3031 = vmatpush1.bf16.msra.mxu0 %v3685_v22  ;;  %3063 = vmatpush1.bf16.msra.mxu1 %v3690_v23 }
 0x5ca   : > { %3033 = vmatprep.subr.bf16.mxu0 %v3692_v24  ;;  %3065 = vmatprep.subr.bf16.mxu1 %v3695_v29 }
 0x5cd   : > { %3035 = vmatpush1.bf16.msra.mxu0 %v3699_v39  ;;  %3067 = vmatpush1.bf16.msra.mxu1 %v3703_v40 }
 0x5ce   : > { %3037 = vmatprep.subr.bf16.mxu0 %v3705_v41  ;;  %3069 = vmatprep.subr.bf16.mxu1 %v3708_v44 }
 0x5d1   : > { %3039 = vmatpush1.bf16.msra.mxu0 %v3711_v50  ;;  %3071 = vmatpush1.bf16.msra.mxu1 %v3715_v51 }
 0x5d2   : > { %3073 = vmatprep.subr.bf16.mxu0 %v3599_v53  ;;  %3105 = vmatprep.subr.bf16.mxu1 %v3601_v57 }
 0x687   : > { %v1785_v19 = vpop.f32.mrb[14].mxu0  ;;  %v1856_v0 = vpop.f32.mrb[14].mxu1 }
 0x688   : > { %v1865_v11 = vrot.slane %v1785_v19, 6  ;;  %v1787_v21 = vpop.f32.mrb[15].mxu0  ;;  %v1858_v58 = vpop.f32.mrb[15].mxu1  ;;  %v1867_v61 = vrot.slane %v1856_v0, 6 }
 0x689   : > { %v1866_v12 = vrot.slane %v1787_v21, 6  ;;  %v1868_v57 = vrot.slane %v1858_v58, 6  ;;  %v1897_v21 = vrot.slane %v4010_v62, 6 }
 0x68a   : > { %v1873_v17 = vadd.f32 %v1865_v11, %v3767_v28  ;;  %v1875_v33 = vadd.f32 %v1867_v61, %v4194_v16 }
 0x68b   : > { %v1874_v35 = vadd.f32 %v1866_v12, %v3769_v34  ;;  %v1876_v18 = vadd.f32 %v1868_v57, %v3773_v42 }
 0x68c   : > { %v2547_v53 = vmul.f32 -1.442695, %v1873_v17 }
 0x68d   : > { %v2548_v43 = vmul.f32 -1.442695, %v1874_v35  ;;  %v2549_v38 = vmul.f32 -1.442695, %v1876_v18 }
 0x68e   : > { %3263 = vpow2.f32 %v2547_v53  ;;  %v4071_v53 = vrot.slane %v4008_v56, %v3836_v8 }
 0x68f   : > { %3265 = vpow2.f32 %v2548_v43 }
 0x690   : > { %3267 = vpow2.f32 %v2549_v38  ;;  %v1917_v43 = vcombine.low %v4071_v53, %v4071_v53 }
 0x691   : > { %3269 = vtanh.f32 %v1875_v33 }
 0x692   : > { %v1924_v18 = vrot.slane %v1917_v43, %v3595_v36  ;;  %v4197_v43 = vld [vmem:[#allocation10_spill] sm:$0xff] }
 0x698   : > { %v3264_v54 = vpop.eup %3263 }
 0x699   : > { %v3266_v59 = vpop.eup %3265  ;;  %v1880_v26 = vadd.f32 1.0, %v3264_v54 }
 0x69a   : > { %v1886_v25 = vadd.f32 1.0, %v3266_v59  ;;  %v3268_v30 = vpop.eup %3267 }
 0x69b   : > { %3271 = vrcp.f32 %v1880_v26  ;;  %v3270_v19 = vpop.eup %3269  ;;  %v1893_v17 = vadd.f32 1.0, %v3268_v30 }
 0x69c   : > { %3273 = vrcp.f32 %v1886_v25 }
 0x69d   : > { %3275 = vrcp.f32 %v1893_v17  ;;  %v4196_v17 = vld [vmem:[#allocation11_spill] sm:$0xff] }
 0x6a5   : > { %v3272_v11 = vpop.eup %3271 }
 0x6a6   : > { %v3274_v58 = vpop.eup %3273  ;;  %v1900_v12 = vmul.f32 %v3272_v11, %v3270_v19 }
 0x6a7   : > { %v1899_v0 = vmul.f32 %v3274_v58, %v1897_v21  ;;  %v3276_v57 = vpop.eup %3275 }
 0x6a9   : > { %v4066_v35 = vadd.f32 %v1900_v12, %v1899_v0  ;;  %v3313_v12 = vld [vmem:[%s3586_s12] sm:$0x3] }
 0x6aa   : > { %v871_v0 = vmul.f32 %v3313_v12, %v4196_v17 }
 0x6ab   : > { %3277 = vtanh.f32 %v4066_v35 }
 0x6b5   : > { %v3278_v62 = vpop.eup %3277 }
 0x6b6   : > { %v1903_v61 = vmul.f32 %v3278_v62, %v3276_v57  ;;  %v3315_v62 = vld [vmem:[%s3586_s12 + $0x4] sm:$0x3] }
 0x6b8   : > { %v1926_v38 = vmul.f32 %v1924_v18, %v1903_v61  ;;  %v1935_v33 = vrot.slane %v1903_v61, 2  ;;  %v4198_v61 = vld [vmem:[#allocation12_spill] sm:$0xff] }
 0x6ba   : > { %2002 = vmatmul.mubr.f32.vlgmr.msra.gmra.mrb[16].mxu0 %v1935_v33  ;;  %2073 = vmatmul.mubr.f32.vlgmr.msra.gmra.mrb[16].mxu1 %v1935_v33  ;;  %v1928_v54 = vrot.slane %v1926_v38, 2  ;;  %v1304_v38 = vmul.f32 %v3315_v62, %v4198_v61  ;;  %v3316_v33 = vld [vmem:[%s3586_s12 + $0x6] sm:$0x3] }
 0x6bb   : > { %3075 = vmatpush1.bf16.msra.mxu0 %v3603_v1  ;;  %3107 = vmatpush1.bf16.msra.mxu1 %v3606_v2  ;;  %v4195_v1 = vld [vmem:[#allocation13_spill] sm:$0xff] }
 0x6bc   : > { %3077 = vmatprep.subr.bf16.mxu0 %v3608_v3  ;;  %3109 = vmatprep.subr.bf16.mxu1 %v3611_v7  ;;  %v4081_v56 = vadd.f32 %v1928_v54, %v4022_v9  ;;  %v2370_v2 = vadd.f32 %v4059_v52, %v4195_v1  ;;  %v1523_v54 = vmul.f32 %v3316_v33, %v3958_v60 }
 0x6bd   : > { %2219 = vmatprep.mubr.f32.mxu0 %v4191_v6  ;;  %2290 = vmatprep.mubr.f32.mxu1 %v4191_v6  ;;  %v2125_v6 = vpop.permute.xlu1 %2124 }
 0x6be   : > { %2373 = vperm.xlu1 %3182, %v2370_v2   ;;  %v2133_v9 = vrot.slane %v2125_v6, %v3836_v8 }
 0x6bf   : > { %3079 = vmatpush1.bf16.msra.mxu0 %v3614_v13  ;;  %3111 = vmatpush1.bf16.msra.mxu1 %v3618_v14 }
 0x6c0   : > { %3081 = vmatprep.subr.bf16.mxu0 %v3620_v15  ;;  %3113 = vmatprep.subr.bf16.mxu1 %v3623_v20  ;;  %v2141_v52 = vrot.slane %v2133_v9, %v3595_v36 }
 0x6c2   : > { %v2142_v26 = vcombine.low %v2141_v52, %v2141_v52 }
 0x6c3   : > { %3083 = vmatpush1.bf16.msra.mxu0 %v3628_v27  ;;  %3115 = vmatpush1.bf16.msra.mxu1 %v3632_v31 }
 0x6c4   : > { %3085 = vmatprep.subr.bf16.mxu0 %v3634_v32  ;;  %3117 = vmatprep.subr.bf16.mxu1 %v3639_v37 }
 0x6c7   : > { %3087 = vmatpush1.bf16.msra.mxu0 %v3651_v45  ;;  %3119 = vmatpush1.bf16.msra.mxu1 %v3656_v48 }
 0x6c8   : > { %3089 = vmatprep.subr.bf16.mxu0 %v3658_v49  ;;  %3121 = vmatprep.subr.bf16.mxu1 %v3665_v55 }
 0x6cb   : > { %3091 = vmatpush1.bf16.msra.mxu0 %v3669_v63  ;;  %3123 = vmatpush1.bf16.msra.mxu1 %v3673_v4 }
 0x6cc   : > { %3093 = vmatprep.subr.bf16.mxu0 %v3675_v5  ;;  %3125 = vmatprep.subr.bf16.mxu1 %v3678_v10 }
 0x6cf   : > { %3095 = vmatpush1.bf16.msra.mxu0 %v3685_v22  ;;  %3127 = vmatpush1.bf16.msra.mxu1 %v3690_v23 }
 0x6d0   : > { %3097 = vmatprep.subr.bf16.mxu0 %v3692_v24  ;;  %3129 = vmatprep.subr.bf16.mxu1 %v3695_v29 }
 0x6d3   : > { %3099 = vmatpush1.bf16.msra.mxu0 %v3699_v39  ;;  %3131 = vmatpush1.bf16.msra.mxu1 %v3703_v40  ;;  %v2115_v39 = vrot.slane %v4066_v35, 6  ;;  %v3314_v35 = vld [vmem:[%s3586_s12 + $0x2] sm:$0x3] }
 0x6d4   : > { %3101 = vmatprep.subr.bf16.mxu0 %v3705_v41  ;;  %3133 = vmatprep.subr.bf16.mxu1 %v3708_v44  ;;  %v1086_v57 = vmul.f32 %v3314_v35, %v4197_v43 }
 0x6d6   : > { %v1087_v18 = vadd.f32 %v1086_v57, %v871_v0 }
 0x6d7   : > { %3103 = vmatpush1.bf16.msra.mxu0 %v3711_v50  ;;  %3135 = vmatpush1.bf16.msra.mxu1 %v3715_v51 }
 0x6d8   : > { %v1305_v1 = vadd.f32 %v1304_v38, %v1087_v18 }
 0x6da   : > { %v1524_v2 = vadd.f32 %v1523_v54, %v1305_v1 }
 0x78d   : > { %v2003_v3 = vpop.f32.mrb[16].mxu0  ;;  %v2074_v7 = vpop.f32.mrb[16].mxu1 }
 0x78e   : > { %v2083_v13 = vrot.slane %v2003_v3, 4  ;;  %v2005_v14 = vpop.f32.mrb[17].mxu0  ;;  %v2076_v15 = vpop.f32.mrb[17].mxu1  ;;  %v2085_v49 = vrot.slane %v2074_v7, 4  ;;  %v3317_v3 = vld [vmem:[%s3586_s12 + $0x8] sm:$0x3] }
 0x78f   : > { %v2084_v20 = vrot.slane %v2005_v14, 4  ;;  %v2086_v45 = vrot.slane %v2076_v15, 4  ;;  %v3318_v7 = vld [vmem:[%s3586_s12 + $0xa] sm:$0x3]  ;;  %v2374_v15 = vpop.permute.xlu1 %2373 }
 0x790   : > { %v2091_v27 = vadd.f32 %v2083_v13, %v3767_v28  ;;  %v2093_v63 = vadd.f32 %v2085_v49, %v4194_v16  ;;  %v1931_v13 = vmul.f32 %v3318_v7, %v4071_v53 }
 0x791   : > { %v2092_v31 = vadd.f32 %v2084_v20, %v3769_v34  ;;  %v2094_v48 = vadd.f32 %v2086_v45, %v3773_v42  ;;  %v2382_v20 = vrot.slane %v2374_v15, %v3836_v8 }
 0x792   : > { %v2550_v32 = vmul.f32 -1.442695, %v2091_v27  ;;  %v2351_v27 = vrot.slane %v4012_v46, %v3836_v8 }
 0x793   : > { %v2551_v37 = vmul.f32 -1.442695, %v2092_v31  ;;  %v2552_v55 = vmul.f32 -1.442695, %v2094_v48 }
 0x794   : > { %3279 = vpow2.f32 %v2550_v32  ;;  %v3319_v32 = vld [vmem:[%s3586_s12 + $0xc] sm:$0x3] }
 0x795   : > { %3281 = vpow2.f32 %v2551_v37  ;;  %v2149_v60 = vmul.f32 %v3319_v32, %v2133_v9  ;;  %v3320_v37 = vld [vmem:[%s3586_s12 + $0xe] sm:$0x3] }
 0x796   : > { %3283 = vpow2.f32 %v2552_v55  ;;  %v2368_v45 = vmul.f32 %v3320_v37, %v2351_v27 }
 0x797   : > { %3285 = vtanh.f32 %v2093_v63 }
 0x79e   : > { %v3280_v4 = vpop.eup %3279 }
 0x79f   : > { %v3282_v5 = vpop.eup %3281  ;;  %v2098_v10 = vadd.f32 1.0, %v3280_v4 }
 0x7a0   : > { %v2104_v22 = vadd.f32 1.0, %v3282_v5  ;;  %v3284_v23 = vpop.eup %3283 }
 0x7a1   : > { %3287 = vrcp.f32 %v2098_v10  ;;  %v3286_v24 = vpop.eup %3285  ;;  %v2111_v44 = vadd.f32 1.0, %v3284_v23 }
 0x7a2   : > { %3289 = vrcp.f32 %v2104_v22 }
 0x7a3   : > { %3291 = vrcp.f32 %v2111_v44 }
 0x7ab   : > { %v3288_v29 = vpop.eup %3287 }
 0x7ac   : > { %v3290_v40 = vpop.eup %3289  ;;  %v2118_v41 = vmul.f32 %v3288_v29, %v3286_v24 }
 0x7ad   : > { %v2117_v50 = vmul.f32 %v3290_v40, %v2115_v39  ;;  %v3292_v59 = vpop.eup %3291 }
 0x7af   : > { %v4118_v51 = vadd.f32 %v2118_v41, %v2117_v50 }
 0x7b1   : > { %3293 = vtanh.f32 %v4118_v51 }
 0x7b2   : > { %3295 = vrcp.f32 %v2382_v20 }
 0x7bb   : > { %v3294_v25 = vpop.eup %3293 }
 0x7bc   : > { %v2121_v30 = vmul.f32 %v3294_v25, %v3292_v59  ;;  %v3296_v49 = vpop.eup %3295 }
 0x7be   : > { %v2144_v19 = vmul.f32 %v2142_v26, %v2121_v30  ;;  %v2153_v11 = vrot.slane %v2121_v30, 4  ;;  %v2333_v26 = vrot.slane %v4118_v51, 6 }
 0x7c0   : > { %v2146_v21 = vrot.slane %v2144_v19, 4  ;;  %2220 = vmatmul.mubr.f32.vlgmr.msra.gmra.mrb[18].mxu0 %v2153_v11  ;;  %2291 = vmatmul.mubr.f32.vlgmr.msra.gmra.mrb[18].mxu1 %v2153_v11 }
 0x7c2   : > { %v4124_v58 = vadd.f32 %v2146_v21, %v4081_v56  ;;  %v1716_v56 = vmul.f32 %v3317_v3, %v4016_v47 }
 0x7c4   : > { %v1717_v14 = vadd.f32 %v1716_v56, %v1524_v2 }
 0x7c6   : > { %v1932_v31 = vadd.f32 %v1931_v13, %v1717_v14 }
 0x7c8   : > { %v2150_v48 = vadd.f32 %v2149_v60, %v1932_v31 }
 0x7ca   : > { %v2369_v47 = vadd.f32 %v2368_v45, %v2150_v48 }
 0x7cc   : > { %v2386_v55 = vmul.f32 %v3296_v49, %v2369_v47 }
 0x7ce   : > { %2387 = vst [vmem:[%s322_s10] sm:$0x3] %v2386_v55 }
 0x893   : > { %v2221_v53 = vpop.f32.mrb[18].mxu0  ;;  %v2292_v63 = vpop.f32.mrb[18].mxu1 }
 0x894   : > { %v2301_v8 = vrot.slane %v2221_v53, 2  ;;  %v2223_v46 = vpop.f32.mrb[19].mxu0  ;;  %v2294_v4 = vpop.f32.mrb[19].mxu1  ;;  %v2303_v40 = vrot.slane %v2292_v63, 2 }
 0x895   : > { %v2302_v5 = vrot.slane %v2223_v46, 2  ;;  %v2304_v29 = vrot.slane %v2294_v4, 2 }
 0x896   : > { %v2309_v10 = vadd.f32 %v2301_v8, %v3767_v28  ;;  %v2311_v44 = vadd.f32 %v2303_v40, %v4194_v16  ;;  %v2353_v16 = vcombine.low %v2351_v27, %v2351_v27 }
 0x897   : > { %v2310_v22 = vadd.f32 %v2302_v5, %v3769_v34  ;;  %v2312_v39 = vadd.f32 %v2304_v29, %v3773_v42 }
 0x898   : > { %v2553_v23 = vmul.f32 -1.442695, %v2309_v10  ;;  %v2360_v21 = vrot.slane %v2353_v16, %v3595_v36 }
 0x899   : > { %v2554_v24 = vmul.f32 -1.442695, %v2310_v22  ;;  %v2555_v41 = vmul.f32 -1.442695, %v2312_v39 }
 0x89a   : > { %3297 = vpow2.f32 %v2553_v23  ;;  %v2361_v0 = vcombine.low %v2360_v21, %v2360_v21 }
 0x89b   : > { %3299 = vpow2.f32 %v2554_v24 }
 0x89c   : > { %3301 = vpow2.f32 %v2555_v41 }
 0x89d   : > { %3303 = vtanh.f32 %v2311_v44 }
 0x8a4   : > { %v3298_v50 = vpop.eup %3297 }
 0x8a5   : > { %v3300_v6 = vpop.eup %3299  ;;  %v2316_v9 = vadd.f32 1.0, %v3298_v50 }
 0x8a6   : > { %v2322_v52 = vadd.f32 1.0, %v3300_v6  ;;  %v3302_v28 = vpop.eup %3301 }
 0x8a7   : > { %3305 = vrcp.f32 %v2316_v9  ;;  %v3304_v34 = vpop.eup %3303  ;;  %v2329_v30 = vadd.f32 1.0, %v3302_v28 }
 0x8a8   : > { %3307 = vrcp.f32 %v2322_v52 }
 0x8a9   : > { %3309 = vrcp.f32 %v2329_v30 }
 0x8b1   : > { %v3306_v59 = vpop.eup %3305 }
 0x8b2   : > { %v3308_v25 = vpop.eup %3307  ;;  %v2336_v42 = vmul.f32 %v3306_v59, %v3304_v34 }
 0x8b3   : > { %v2335_v19 = vmul.f32 %v3308_v25, %v2333_v26  ;;  %v3310_v12 = vpop.eup %3309 }
 0x8b5   : > { %v2337_v11 = vadd.f32 %v2336_v42, %v2335_v19 }
 0x8b7   : > { %3311 = vtanh.f32 %v2337_v11 }
 0x8c1   : > { %v3312_v17 = vpop.eup %3311 }
 0x8c2   : > { %v2339_v35 = vmul.f32 %v3312_v17, %v3310_v12 }
 0x8c4   : > { %v2363_v43 = vmul.f32 %v2361_v0, %v2339_v35 }
 0x8c6   : > { %v2365_v57 = vrot.slane %v2363_v43, 6 }
 0x8c8   : > { %v2367_v18 = vadd.f32 %v2365_v57, %v4124_v58 }
 0x8ca   : > { %v2384_v51 = vmul.f32 %v3296_v49, %v2367_v18 }
 0x8cc   : > { %2385 = vst [vmem:[%s318_s14] sm:$0x3] %v2384_v51 }
 0x8cd PF: > { %s19_s21 = sadd.s32 1, %s3419_s21  }
 0x8ce   : > { %p16_p9 = scmp.ge.s32.totalorder %s19_s21, 5  }
 0x8d0   :  { %18 = sbr.rel (!%p16_p9) target bundleno = 2 (0x2), region = 98 }
 0x8d7   :  { %2421 = vsyncpa [#allocation3], 1 }
 0x8d8   :  { %2423 = vsyncpa [#allocation3 + $0x1], 1 }
 0x8d9   :  { %2424 = vsyncpa [#allocation5], 1 }

</bundles_post_ra>
